<compile_context>
chip_gen: v6e
topology: v6e:2x2x1
jax: 0.10.0
libtpu: 0.0.40
codegen_flags: <defaults>
</compile_context>

<pallas_src>
import functools

import jax
import jax.numpy as jnp
from jax import lax
from jax.experimental import pallas as pl
from jax.experimental.pallas import tpu as pltpu


# ----------------------------------------------------------------------------
# Pallas kernels
# ----------------------------------------------------------------------------
def _conv_packed_kernel(patch_ref, w_ref, b_ref,        # inputs
                        out_ref, stats_ref,             # outputs
                        *, m_valid, tm, need_mask):
    """grid = (M_tiles,).  One packed matmul per tile:
         y = patches[tile] @ W_packed + bias            ([tm, 27*Cin] x [27*Cin, Cout])
       Also emits per-tile partial BN statistics (sum / sum of squares) into
       stats_ref rows 0 and 1, so the grid axis can be 'parallel'.
    """
    y = jnp.dot(patch_ref[...], w_ref[...], preferred_element_type=jnp.float32)
    y = y + b_ref[...]                                   # (tm, Cout) + (1, Cout)
    out_ref[...] = y.astype(out_ref.dtype)

    cout = y.shape[1]

    def _write_stats(yv):
        s = jnp.sum(yv, axis=0, keepdims=True)           # (1, Cout)
        q = jnp.sum(yv * yv, axis=0, keepdims=True)      # (1, Cout)
        row = lax.broadcasted_iota(jnp.int32, (8, cout), 0)
        stats_ref[...] = (jnp.where(row == 0, s, 0.0)
                          + jnp.where(row == 1, q, 0.0))

    if need_mask:
        i = pl.program_id(0)
        is_last = i == pl.num_programs(0) - 1

        @pl.when(is_last)
        def _():
            rows = lax.broadcasted_iota(jnp.int32, y.shape, 0) + i * tm
            _write_stats(jnp.where(rows < m_valid, y, 0.0))

        @pl.when(jnp.logical_not(is_last))
        def _():
            _write_stats(y)
    else:
        _write_stats(y)


def _bn_affine_kernel(x_ref, scale_ref, shift_ref, o_ref, *, relu):
    y = x_ref[...] * scale_ref[...] + shift_ref[...]
    if relu:
        y = jnp.maximum(y, 0.0)
    o_ref[...] = y.astype(o_ref.dtype)


# ----------------------------------------------------------------------------
# pallas_call wrappers
# ----------------------------------------------------------------------------
_VMEM_LIMIT = 32 * 1024 * 1024      # safe on v5e (16 MiB default) .. v7x (64 MiB phys)
_TILE_BUDGET = 8 * 1024 * 1024      # bytes for double-buffered patch tiles


def _round_up(x, m):
    return ((x + m - 1) // m) * m


def _pick_tm(m, kc):
    """Largest row tile (multiple of 128, <= 2048) whose double-buffered
    patch block fits in the VMEM budget."""
    tm = _TILE_BUDGET // (2 * kc * 4)
    tm = max(128, min(2048, (tm // 128) * 128))
    return min(tm, _round_up(m, 128))


def conv3d_packed_pallas(patches, w_packed, bias):
    """patches: [M, 27*Cin]; w_packed: [27*Cin, Cout]; bias: [Cout].

    Returns (conv_out [M, Cout] f32, per-channel sum, per-channel sum-of-squares).
    """
    M, Kc = patches.shape
    Cout = w_packed.shape[1]
    tm = _pick_tm(M, Kc)
    m_pad = _round_up(M, tm)
    if m_pad != M:
        patches = jnp.pad(patches, ((0, m_pad - M), (0, 0)))
    n_tiles = m_pad // tm

    kernel = functools.partial(_conv_packed_kernel, m_valid=M, tm=tm,
                               need_mask=(m_pad != M))
    out, stats = pl.pallas_call(
        kernel,
        out_shape=(jax.ShapeDtypeStruct((m_pad, Cout), jnp.float32),
                   jax.ShapeDtypeStruct((n_tiles, 8, Cout), jnp.float32)),
        grid_spec=pltpu.PrefetchScalarGridSpec(
            num_scalar_prefetch=0,
            grid=(n_tiles,),
            in_specs=[
                pl.BlockSpec((tm, Kc), lambda i: (i, 0)),
                pl.BlockSpec((Kc, Cout), lambda i: (0, 0)),   # weights resident
                pl.BlockSpec((1, Cout), lambda i: (0, 0)),
            ],
            out_specs=(
                pl.BlockSpec((tm, Cout), lambda i: (i, 0)),
                pl.BlockSpec((None, 8, Cout), lambda i: (i, 0, 0)),
            ),
        ),
        compiler_params=pltpu.CompilerParams(
            dimension_semantics=("parallel",),
            vmem_limit_bytes=_VMEM_LIMIT),
    )(patches.astype(jnp.float32), w_packed.astype(jnp.float32),
      bias.reshape(1, Cout).astype(jnp.float32))

    csum = jnp.sum(stats[:, 0, :], axis=0)
    cssq = jnp.sum(stats[:, 1, :], axis=0)
    return out[:M], csum, cssq


def bn_affine_pallas(x, scale, shift, *, relu):
    """x: [M, C]; y = x*scale + shift (+ relu) per channel.

    If 128 % C == 0, works on a lane-dense [M*C/128, 128] view so every
    load/store uses full 128-lane vregs.
    """
    M, C = x.shape
    scale = scale.astype(jnp.float32)
    shift = shift.astype(jnp.float32)
    kern = functools.partial(_bn_affine_kernel, relu=relu)
    cp = pltpu.CompilerParams(dimension_semantics=("parallel",),
                              vmem_limit_bytes=_VMEM_LIMIT)

    if 128 % C == 0:
        rep = 128 // C
        total = M * C
        rows = -(-total // 128)
        tr = min(1024, _round_up(rows, 8))
        rows_pad = _round_up(rows, tr)
        flat = jnp.pad(x.reshape(-1), (0, rows_pad * 128 - total))
        x2 = flat.reshape(rows_pad, 128)
        s2 = jnp.tile(scale, rep).reshape(1, 128)
        h2 = jnp.tile(shift, rep).reshape(1, 128)
        out = pl.pallas_call(
            kern,
            out_shape=jax.ShapeDtypeStruct((rows_pad, 128), jnp.float32),
            grid_spec=pltpu.PrefetchScalarGridSpec(
                num_scalar_prefetch=0,
                grid=(rows_pad // tr,),
                in_specs=[pl.BlockSpec((tr, 128), lambda i: (i, 0)),
                          pl.BlockSpec((1, 128), lambda i: (0, 0)),
                          pl.BlockSpec((1, 128), lambda i: (0, 0))],
                out_specs=pl.BlockSpec((tr, 128), lambda i: (i, 0)),
            ),
            compiler_params=cp,
        )(x2, s2, h2)
        return out.reshape(-1)[:total].reshape(M, C)

    # Fallback (C does not divide 128): channel-last tiles.
    tm = min(1024, _round_up(M, 8))
    m_pad = _round_up(M, tm)
    xp = jnp.pad(x, ((0, m_pad - M), (0, 0))) if m_pad != M else x
    out = pl.pallas_call(
        kern,
        out_shape=jax.ShapeDtypeStruct((m_pad, C), jnp.float32),
        grid_spec=pltpu.PrefetchScalarGridSpec(
            num_scalar_prefetch=0,
            grid=(m_pad // tm,),
            in_specs=[pl.BlockSpec((tm, C), lambda i: (i, 0)),
                      pl.BlockSpec((1, C), lambda i: (0, 0)),
                      pl.BlockSpec((1, C), lambda i: (0, 0))],
            out_specs=pl.BlockSpec((tm, C), lambda i: (i, 0)),
        ),
        compiler_params=cp,
    )(xp, scale.reshape(1, C), shift.reshape(1, C))
    return out[:M]


# ----------------------------------------------------------------------------
# Glue: packed im2col, packed weights, BN statistics -> affine fold
# ----------------------------------------------------------------------------
def _im2col_3d_packed(x_ndhwc, stride):
    """x: [N, D, H, W, C], kernel=3, pad=1 -> ([M, 27*C], out spatial dims).

    Tap order (kd, kh, kw) with channel fastest, matching _weights_to_packed.
    """
    N, D, H, W, C = x_ndhwc.shape
    xp = jnp.pad(x_ndhwc, ((0, 0), (1, 1), (1, 1), (1, 1), (0, 0)))
    Do = (D + 2 - 3) // stride + 1
    Ho = (H + 2 - 3) // stride + 1
    Wo = (W + 2 - 3) // stride + 1
    taps = []
    for kd in range(3):
        for kh in range(3):
            for kw in range(3):
                sl = xp[:,
                        kd:kd + stride * (Do - 1) + 1:stride,
                        kh:kh + stride * (Ho - 1) + 1:stride,
                        kw:kw + stride * (Wo - 1) + 1:stride, :]
                taps.append(sl)
    packed = jnp.concatenate(taps, axis=-1)               # [N,Do,Ho,Wo,27*C]
    return packed.reshape(N * Do * Ho * Wo, 27 * C), (N, Do, Ho, Wo)


def _weights_to_packed(w_oidhw):
    """[O, I, 3, 3, 3] -> [27*I, O] with index ((kd*3+kh)*3+kw)*I + i."""
    O, I = w_oidhw.shape[0], w_oidhw.shape[1]
    return jnp.transpose(w_oidhw, (2, 3, 4, 1, 0)).reshape(27 * I, O)


def _bn_train_fold(csum, cssq, count, gamma, beta, eps=1e-5):
    # NOTE: E[x^2] - E[x]^2 in f32; fine at these scales (see review note).
    mean = csum / count
    var = cssq / count - mean * mean          # biased variance (training BN)
    scale = gamma / jnp.sqrt(var + eps)
    shift = beta - mean * scale
    return scale, shift


# ----------------------------------------------------------------------------
# Full downsampleblock forward
# ----------------------------------------------------------------------------
def downsampleblock_forward(x_ncdhw, params, stride=2):
    x = jnp.transpose(x_ncdhw, (0, 2, 3, 4, 1)).astype(jnp.float32)  # NDHWC
    c_out = params["w1"].shape[0]

    # ---- conv1 (stride=2) + BN1 (training stats) + ReLU -------------------
    patches1, (N, D1, H1, W1) = _im2col_3d_packed(x, stride)
    y1, s1, q1 = conv3d_packed_pallas(patches1, _weights_to_packed(params["w1"]),
                                      params["b1"])
    m1 = N * D1 * H1 * W1
    sc1, sh1 = _bn_train_fold(s1, q1, float(m1), params["g1"], params["be1"])
    y1 = bn_affine_pallas(y1, sc1, sh1, relu=True).reshape(N, D1, H1, W1, c_out)

    # ---- conv2 (stride=1) + BN2 (training stats) --------------------------
    patches2, (_, D2, H2, W2) = _im2col_3d_packed(y1, 1)
    y2, s2, q2 = conv3d_packed_pallas(patches2, _weights_to_packed(params["w2"]),
                                      params["b2"])
    m2 = N * D2 * H2 * W2
    sc2, sh2 = _bn_train_fold(s2, q2, float(m2), params["g2"], params["be2"])
    y2 = bn_affine_pallas(y2, sc2, sh2, relu=False).reshape(N, D2, H2, W2, c_out)

    return jnp.transpose(y2, (0, 4, 1, 2, 3))  # back to NCDHW


# ----------------------------------------------------------------------------
# Pure-JAX reference (for verification)
# ----------------------------------------------------------------------------
def _ref_forward(x, params, stride=2, eps=1e-5):
    dn = ("NCDHW", "OIDHW", "NCDHW")

    def bn_train(y, g, b):
        mean = y.mean(axis=(0, 2, 3, 4)).reshape(1, -1, 1, 1, 1)
        var = y.var(axis=(0, 2, 3, 4)).reshape(1, -1, 1, 1, 1)
        return ((y - mean) / jnp.sqrt(var + eps)) * g.reshape(1, -1, 1, 1, 1) \
            + b.reshape(1, -1, 1, 1, 1)

    y = lax.conv_general_dilated(x, params["w1"], (stride,) * 3,
                                 [(1, 1)] * 3, dimension_numbers=dn)
    y = y + params["b1"].reshape(1, -1, 1, 1, 1)
    y = jnp.maximum(bn_train(y, params["g1"], params["be1"]), 0.0)
    y = lax.conv_general_dilated(y, params["w2"], (1, 1, 1),
                                 [(1, 1)] * 3, dimension_numbers=dn)
    y = y + params["b2"].reshape(1, -1, 1, 1, 1)
    return bn_train(y, params["g2"], params["be2"])


# ----------------------------------------------------------------------------
if __name__ == "__main__":
    N, C_IN, C_OUT, D, H, W = 2, 4, 8, 8, 8, 8

    key = jax.random.PRNGKey(0)
    kx, k1, k2, k3, k4, k5, k6 = jax.random.split(key, 7)

    x = jax.random.normal(kx, (N, C_IN, D, H, W), dtype=jnp.float32)
    params = {
        "w1": 0.2 * jax.random.normal(k1, (C_OUT, C_IN, 3, 3, 3), jnp.float32),
        "b1": 0.1 * jax.random.normal(k2, (C_OUT,), jnp.float32),
        "w2": 0.2 * jax.random.normal(k3, (C_OUT, C_OUT, 3, 3, 3), jnp.float32),
        "b2": 0.1 * jax.random.normal(k4, (C_OUT,), jnp.float32),
        "g1": 1.0 + 0.1 * jax.random.normal(k5, (C_OUT,), jnp.float32),
        "be1": 0.1 * jax.random.normal(k6, (C_OUT,), jnp.float32),
        "g2": jnp.ones((C_OUT,), jnp.float32),
        "be2": jnp.zeros((C_OUT,), jnp.float32),
    }

    out = jax.jit(downsampleblock_forward)(x, params)
    out = jax.block_until_ready(out)

    ref = _ref_forward(x, params)
    assert out.shape == ref.shape, (out.shape, ref.shape)
    assert jnp.allclose(out, ref, rtol=1e-3, atol=1e-3), \
        float(jnp.max(jnp.abs(out - ref)))

    print("KERNEL_OK")
</pallas_src>

<mosaic_0001>
module attributes {stable_mosaic.version = 11 : i64} {
  func.func @_bn_affine_kernel(%arg0: i32, %arg1: memref<8x128xf32, #tpu.memory_space<vmem>>, %arg2: memref<1x128xf32, #tpu.memory_space<vmem>>, %arg3: memref<1x128xf32, #tpu.memory_space<vmem>>, %arg4: memref<8x128xf32, #tpu.memory_space<vmem>>) attributes {dimension_semantics = [#tpu.dimension_semantics<parallel>], iteration_bounds = array<i64: 1>, scalar_prefetch = 0 : i64, scratch_operands = 0 : i64, tpu.core_type = #tpu.core_type<tc>, window_params = [{transform_indices = @transform_0, window_bounds = array<i64: 8, 128>}, {pipeline_mode = #tpu.pipeline_mode<synchronous>, transform_indices = @transform_1, window_bounds = array<i64: 1, 128>}, {pipeline_mode = #tpu.pipeline_mode<synchronous>, transform_indices = @transform_2, window_bounds = array<i64: 1, 128>}, {transform_indices = @transform_3, window_bounds = array<i64: 8, 128>}]} {
    %c0 = arith.constant 0 : index
    %c0_0 = arith.constant 0 : index
    %0 = vector.load %arg1[%c0, %c0_0] : memref<8x128xf32, #tpu.memory_space<vmem>>, vector<8x128xf32>
    %c0_1 = arith.constant 0 : index
    %c0_2 = arith.constant 0 : index
    %1 = vector.load %arg2[%c0_1, %c0_2] : memref<1x128xf32, #tpu.memory_space<vmem>>, vector<1x128xf32>
    %2 = vector.broadcast %1 : vector<1x128xf32> to vector<8x128xf32>
    %3 = arith.mulf %0, %2 : vector<8x128xf32>
    %c0_3 = arith.constant 0 : index
    %c0_4 = arith.constant 0 : index
    %4 = vector.load %arg3[%c0_3, %c0_4] : memref<1x128xf32, #tpu.memory_space<vmem>>, vector<1x128xf32>
    %5 = vector.broadcast %4 : vector<1x128xf32> to vector<8x128xf32>
    %6 = arith.addf %3, %5 : vector<8x128xf32>
    %cst = arith.constant 0.000000e+00 : f32
    %7 = vector.broadcast %cst : f32 to vector<8x128xf32>
    %8 = arith.maximumf %6, %7 : vector<8x128xf32>
    %c0_5 = arith.constant 0 : index
    %c0_6 = arith.constant 0 : index
    %9 = vector.load %arg4[%c0_5, %c0_6] : memref<8x128xf32, #tpu.memory_space<vmem>>, vector<8x128xf32>
    tpu.vector_store %arg4[%c0_5, %c0_6], %8 {strides = array<i32>} : memref<8x128xf32, #tpu.memory_space<vmem>>, vector<8x128xf32>,
    return
  }
  func.func @transform_0(%arg0: i32) -> (i32, i32) {
    %c0_i32 = arith.constant 0 : i32
    %c0_i32_0 = arith.constant 0 : i32
    return %arg0, %c0_i32 : i32, i32
  }
  func.func @transform_1(%arg0: i32) -> (i32, i32) {
    %c0_i32 = arith.constant 0 : i32
    %c0_i32_0 = arith.constant 0 : i32
    %c0_i32_1 = arith.constant 0 : i32
    return %c0_i32, %c0_i32_0 : i32, i32
  }
  func.func @transform_2(%arg0: i32) -> (i32, i32) {
    %c0_i32 = arith.constant 0 : i32
    %c0_i32_0 = arith.constant 0 : i32
    %c0_i32_1 = arith.constant 0 : i32
    return %c0_i32, %c0_i32_0 : i32, i32
  }
  func.func @transform_3(%arg0: i32) -> (i32, i32) {
    %c0_i32 = arith.constant 0 : i32
    %c0_i32_0 = arith.constant 0 : i32
    return %arg0, %c0_i32 : i32, i32
  }
}

module attributes {stable_mosaic.version = 11 : i64} {
  func.func @_conv_packed_kernel(%arg0: i32, %arg1: memref<128x108xf32, #tpu.memory_space<vmem>>, %arg2: memref<108x8xf32, #tpu.memory_space<vmem>>, %arg3: memref<1x8xf32, #tpu.memory_space<vmem>>, %arg4: memref<128x8xf32, #tpu.memory_space<vmem>>, %arg5: memref<1x8x8xf32, #tpu.memory_space<vmem>>) attributes {dimension_semantics = [#tpu.dimension_semantics<parallel>], iteration_bounds = array<i64: 1>, scalar_prefetch = 0 : i64, scratch_operands = 0 : i64, tpu.core_type = #tpu.core_type<tc>, window_params = [{transform_indices = @transform_0, window_bounds = array<i64: 128, 108>}, {pipeline_mode = #tpu.pipeline_mode<synchronous>, transform_indices = @transform_1, window_bounds = array<i64: 108, 8>}, {pipeline_mode = #tpu.pipeline_mode<synchronous>, transform_indices = @transform_2, window_bounds = array<i64: 1, 8>}, {transform_indices = @transform_3, window_bounds = array<i64: 128, 8>}, {transform_indices = @transform_4, window_bounds = array<i64: 1, 8, 8>}]} {
    %c0 = arith.constant 0 : index
    %c0_0 = arith.constant 0 : index
    %0 = vector.load %arg1[%c0, %c0_0] : memref<128x108xf32, #tpu.memory_space<vmem>>, vector<128x108xf32>
    %c0_1 = arith.constant 0 : index
    %c0_2 = arith.constant 0 : index
    %1 = vector.load %arg2[%c0_1, %c0_2] : memref<108x8xf32, #tpu.memory_space<vmem>>, vector<108x8xf32>
    %cst = arith.constant dense<0.000000e+00> : vector<128x8xf32>
    %2 = tpu.matmul %0, %1, %cst {dimension_numbers = #tpu.dot_dimension_numbers<[1], [0], [0], [1], [0, 0, 1, 1], [], []>} : vector<128x108xf32>, vector<108x8xf32>, vector<128x8xf32> -> vector<128x8xf32>
    %c0_3 = arith.constant 0 : index
    %c0_4 = arith.constant 0 : index
    %3 = vector.load %arg3[%c0_3, %c0_4] : memref<1x8xf32, #tpu.memory_space<vmem>>, vector<1x8xf32>
    %4 = vector.broadcast %3 : vector<1x8xf32> to vector<128x8xf32>
    %5 = arith.addf %2, %4 : vector<128x8xf32>
    %c0_5 = arith.constant 0 : index
    %c0_6 = arith.constant 0 : index
    %6 = vector.load %arg4[%c0_5, %c0_6] : memref<128x8xf32, #tpu.memory_space<vmem>>, vector<128x8xf32>
    tpu.vector_store %arg4[%c0_5, %c0_6], %5 {strides = array<i32>} : memref<128x8xf32, #tpu.memory_space<vmem>>, vector<128x8xf32>,
    %cst_7 = arith.constant dense<0.000000e+00> : vector<8xf32>
    %7 = vector.multi_reduction <add>, %5, %cst_7 [0] : vector<128x8xf32> to vector<8xf32>
    %8 = vector.shape_cast %7 : vector<8xf32> to vector<1x8xf32>
    %9 = arith.mulf %5, %5 : vector<128x8xf32>
    %cst_8 = arith.constant dense<0.000000e+00> : vector<8xf32>
    %10 = vector.multi_reduction <add>, %9, %cst_8 [0] : vector<128x8xf32> to vector<8xf32>
    %11 = vector.shape_cast %10 : vector<8xf32> to vector<1x8xf32>
    %12 = tpu.iota {dimensions = array<i32: 0>} : vector<8x8xi32>
    %c0_i32 = arith.constant 0 : i32
    %13 = vector.broadcast %c0_i32 : i32 to vector<8x8xi32>
    %14 = arith.cmpi eq, %12, %13 : vector<8x8xi32>
    %cst_9 = arith.constant 0.000000e+00 : f32
    %15 = vector.shape_cast %8 : vector<1x8xf32> to vector<1x8xf32>
    %16 = vector.broadcast %15 : vector<1x8xf32> to vector<8x8xf32>
    %17 = vector.broadcast %cst_9 : f32 to vector<8x8xf32>
    %18 = arith.select %14, %16, %17 : vector<8x8xi1>, vector<8x8xf32>
    %c1_i32 = arith.constant 1 : i32
    %19 = vector.broadcast %c1_i32 : i32 to vector<8x8xi32>
    %20 = arith.cmpi eq, %12, %19 : vector<8x8xi32>
    %cst_10 = arith.constant 0.000000e+00 : f32
    %21 = vector.shape_cast %11 : vector<1x8xf32> to vector<1x8xf32>
    %22 = vector.broadcast %21 : vector<1x8xf32> to vector<8x8xf32>
    %23 = vector.broadcast %cst_10 : f32 to vector<8x8xf32>
    %24 = arith.select %20, %22, %23 : vector<8x8xi1>, vector<8x8xf32>
    %25 = arith.addf %18, %24 : vector<8x8xf32>
    %c0_11 = arith.constant 0 : index
    %c0_12 = arith.constant 0 : index
    %c0_13 = arith.constant 0 : index
    %26 = vector.load %arg5[%c0_11, %c0_12, %c0_13] : memref<1x8x8xf32, #tpu.memory_space<vmem>>, vector<1x8x8xf32>
    %27 = vector.shape_cast %26 : vector<1x8x8xf32> to vector<8x8xf32>
    %28 = vector.shape_cast %25 : vector<8x8xf32> to vector<1x8x8xf32>
    tpu.vector_store %arg5[%c0_11, %c0_12, %c0_13], %28 {strides = array<i32>} : memref<1x8x8xf32, #tpu.memory_space<vmem>>, vector<1x8x8xf32>,
    return
  }
  func.func @transform_0(%arg0: i32) -> (i32, i32) {
    %c0_i32 = arith.constant 0 : i32
    %c0_i32_0 = arith.constant 0 : i32
    return %arg0, %c0_i32 : i32, i32
  }
  func.func @transform_1(%arg0: i32) -> (i32, i32) {
    %c0_i32 = arith.constant 0 : i32
    %c0_i32_0 = arith.constant 0 : i32
    %c0_i32_1 = arith.constant 0 : i32
    return %c0_i32, %c0_i32_0 : i32, i32
  }
  func.func @transform_2(%arg0: i32) -> (i32, i32) {
    %c0_i32 = arith.constant 0 : i32
    %c0_i32_0 = arith.constant 0 : i32
    %c0_i32_1 = arith.constant 0 : i32
    return %c0_i32, %c0_i32_0 : i32, i32
  }
  func.func @transform_3(%arg0: i32) -> (i32, i32) {
    %c0_i32 = arith.constant 0 : i32
    %c0_i32_0 = arith.constant 0 : i32
    return %arg0, %c0_i32 : i32, i32
  }
  func.func @transform_4(%arg0: i32) -> (i32, i32, i32) {
    %c0_i32 = arith.constant 0 : i32
    %c0_i32_0 = arith.constant 0 : i32
    %c0_i32_1 = arith.constant 0 : i32
    return %arg0, %c0_i32, %c0_i32_0 : i32, i32, i32
  }
}

module attributes {stable_mosaic.version = 11 : i64} {
  func.func @_conv_packed_kernel(%arg0: i32, %arg1: memref<128x216xf32, #tpu.memory_space<vmem>>, %arg2: memref<216x8xf32, #tpu.memory_space<vmem>>, %arg3: memref<1x8xf32, #tpu.memory_space<vmem>>, %arg4: memref<128x8xf32, #tpu.memory_space<vmem>>, %arg5: memref<1x8x8xf32, #tpu.memory_space<vmem>>) attributes {dimension_semantics = [#tpu.dimension_semantics<parallel>], iteration_bounds = array<i64: 1>, scalar_prefetch = 0 : i64, scratch_operands = 0 : i64, tpu.core_type = #tpu.core_type<tc>, window_params = [{transform_indices = @transform_0, window_bounds = array<i64: 128, 216>}, {pipeline_mode = #tpu.pipeline_mode<synchronous>, transform_indices = @transform_1, window_bounds = array<i64: 216, 8>}, {pipeline_mode = #tpu.pipeline_mode<synchronous>, transform_indices = @transform_2, window_bounds = array<i64: 1, 8>}, {transform_indices = @transform_3, window_bounds = array<i64: 128, 8>}, {transform_indices = @transform_4, window_bounds = array<i64: 1, 8, 8>}]} {
    %c0 = arith.constant 0 : index
    %c0_0 = arith.constant 0 : index
    %0 = vector.load %arg1[%c0, %c0_0] : memref<128x216xf32, #tpu.memory_space<vmem>>, vector<128x216xf32>
    %c0_1 = arith.constant 0 : index
    %c0_2 = arith.constant 0 : index
    %1 = vector.load %arg2[%c0_1, %c0_2] : memref<216x8xf32, #tpu.memory_space<vmem>>, vector<216x8xf32>
    %cst = arith.constant dense<0.000000e+00> : vector<128x8xf32>
    %2 = tpu.matmul %0, %1, %cst {dimension_numbers = #tpu.dot_dimension_numbers<[1], [0], [0], [1], [0, 0, 1, 1], [], []>} : vector<128x216xf32>, vector<216x8xf32>, vector<128x8xf32> -> vector<128x8xf32>
    %c0_3 = arith.constant 0 : index
    %c0_4 = arith.constant 0 : index
    %3 = vector.load %arg3[%c0_3, %c0_4] : memref<1x8xf32, #tpu.memory_space<vmem>>, vector<1x8xf32>
    %4 = vector.broadcast %3 : vector<1x8xf32> to vector<128x8xf32>
    %5 = arith.addf %2, %4 : vector<128x8xf32>
    %c0_5 = arith.constant 0 : index
    %c0_6 = arith.constant 0 : index
    %6 = vector.load %arg4[%c0_5, %c0_6] : memref<128x8xf32, #tpu.memory_space<vmem>>, vector<128x8xf32>
    tpu.vector_store %arg4[%c0_5, %c0_6], %5 {strides = array<i32>} : memref<128x8xf32, #tpu.memory_space<vmem>>, vector<128x8xf32>,
    %cst_7 = arith.constant dense<0.000000e+00> : vector<8xf32>
    %7 = vector.multi_reduction <add>, %5, %cst_7 [0] : vector<128x8xf32> to vector<8xf32>
    %8 = vector.shape_cast %7 : vector<8xf32> to vector<1x8xf32>
    %9 = arith.mulf %5, %5 : vector<128x8xf32>
    %cst_8 = arith.constant dense<0.000000e+00> : vector<8xf32>
    %10 = vector.multi_reduction <add>, %9, %cst_8 [0] : vector<128x8xf32> to vector<8xf32>
    %11 = vector.shape_cast %10 : vector<8xf32> to vector<1x8xf32>
    %12 = tpu.iota {dimensions = array<i32: 0>} : vector<8x8xi32>
    %c0_i32 = arith.constant 0 : i32
    %13 = vector.broadcast %c0_i32 : i32 to vector<8x8xi32>
    %14 = arith.cmpi eq, %12, %13 : vector<8x8xi32>
    %cst_9 = arith.constant 0.000000e+00 : f32
    %15 = vector.shape_cast %8 : vector<1x8xf32> to vector<1x8xf32>
    %16 = vector.broadcast %15 : vector<1x8xf32> to vector<8x8xf32>
    %17 = vector.broadcast %cst_9 : f32 to vector<8x8xf32>
    %18 = arith.select %14, %16, %17 : vector<8x8xi1>, vector<8x8xf32>
    %c1_i32 = arith.constant 1 : i32
    %19 = vector.broadcast %c1_i32 : i32 to vector<8x8xi32>
    %20 = arith.cmpi eq, %12, %19 : vector<8x8xi32>
    %cst_10 = arith.constant 0.000000e+00 : f32
    %21 = vector.shape_cast %11 : vector<1x8xf32> to vector<1x8xf32>
    %22 = vector.broadcast %21 : vector<1x8xf32> to vector<8x8xf32>
    %23 = vector.broadcast %cst_10 : f32 to vector<8x8xf32>
    %24 = arith.select %20, %22, %23 : vector<8x8xi1>, vector<8x8xf32>
    %25 = arith.addf %18, %24 : vector<8x8xf32>
    %c0_11 = arith.constant 0 : index
    %c0_12 = arith.constant 0 : index
    %c0_13 = arith.constant 0 : index
    %26 = vector.load %arg5[%c0_11, %c0_12, %c0_13] : memref<1x8x8xf32, #tpu.memory_space<vmem>>, vector<1x8x8xf32>
    %27 = vector.shape_cast %26 : vector<1x8x8xf32> to vector<8x8xf32>
    %28 = vector.shape_cast %25 : vector<8x8xf32> to vector<1x8x8xf32>
    tpu.vector_store %arg5[%c0_11, %c0_12, %c0_13], %28 {strides = array<i32>} : memref<1x8x8xf32, #tpu.memory_space<vmem>>, vector<1x8x8xf32>,
    return
  }
  func.func @transform_0(%arg0: i32) -> (i32, i32) {
    %c0_i32 = arith.constant 0 : i32
    %c0_i32_0 = arith.constant 0 : i32
    return %arg0, %c0_i32 : i32, i32
  }
  func.func @transform_1(%arg0: i32) -> (i32, i32) {
    %c0_i32 = arith.constant 0 : i32
    %c0_i32_0 = arith.constant 0 : i32
    %c0_i32_1 = arith.constant 0 : i32
    return %c0_i32, %c0_i32_0 : i32, i32
  }
  func.func @transform_2(%arg0: i32) -> (i32, i32) {
    %c0_i32 = arith.constant 0 : i32
    %c0_i32_0 = arith.constant 0 : i32
    %c0_i32_1 = arith.constant 0 : i32
    return %c0_i32, %c0_i32_0 : i32, i32
  }
  func.func @transform_3(%arg0: i32) -> (i32, i32) {
    %c0_i32 = arith.constant 0 : i32
    %c0_i32_0 = arith.constant 0 : i32
    return %arg0, %c0_i32 : i32, i32
  }
  func.func @transform_4(%arg0: i32) -> (i32, i32, i32) {
    %c0_i32 = arith.constant 0 : i32
    %c0_i32_0 = arith.constant 0 : i32
    %c0_i32_1 = arith.constant 0 : i32
    return %arg0, %c0_i32, %c0_i32_0 : i32, i32, i32
  }
}

module attributes {stable_mosaic.version = 11 : i64} {
  func.func @_bn_affine_kernel(%arg0: i32, %arg1: memref<8x128xf32, #tpu.memory_space<vmem>>, %arg2: memref<1x128xf32, #tpu.memory_space<vmem>>, %arg3: memref<1x128xf32, #tpu.memory_space<vmem>>, %arg4: memref<8x128xf32, #tpu.memory_space<vmem>>) attributes {dimension_semantics = [#tpu.dimension_semantics<parallel>], iteration_bounds = array<i64: 1>, scalar_prefetch = 0 : i64, scratch_operands = 0 : i64, tpu.core_type = #tpu.core_type<tc>, window_params = [{transform_indices = @transform_0, window_bounds = array<i64: 8, 128>}, {pipeline_mode = #tpu.pipeline_mode<synchronous>, transform_indices = @transform_1, window_bounds = array<i64: 1, 128>}, {pipeline_mode = #tpu.pipeline_mode<synchronous>, transform_indices = @transform_2, window_bounds = array<i64: 1, 128>}, {transform_indices = @transform_3, window_bounds = array<i64: 8, 128>}]} {
    %c0 = arith.constant 0 : index
    %c0_0 = arith.constant 0 : index
    %0 = vector.load %arg1[%c0, %c0_0] : memref<8x128xf32, #tpu.memory_space<vmem>>, vector<8x128xf32>
    %c0_1 = arith.constant 0 : index
    %c0_2 = arith.constant 0 : index
    %1 = vector.load %arg2[%c0_1, %c0_2] : memref<1x128xf32, #tpu.memory_space<vmem>>, vector<1x128xf32>
    %2 = vector.broadcast %1 : vector<1x128xf32> to vector<8x128xf32>
    %3 = arith.mulf %0, %2 : vector<8x128xf32>
    %c0_3 = arith.constant 0 : index
    %c0_4 = arith.constant 0 : index
    %4 = vector.load %arg3[%c0_3, %c0_4] : memref<1x128xf32, #tpu.memory_space<vmem>>, vector<1x128xf32>
    %5 = vector.broadcast %4 : vector<1x128xf32> to vector<8x128xf32>
    %6 = arith.addf %3, %5 : vector<8x128xf32>
    %c0_5 = arith.constant 0 : index
    %c0_6 = arith.constant 0 : index
    %7 = vector.load %arg4[%c0_5, %c0_6] : memref<8x128xf32, #tpu.memory_space<vmem>>, vector<8x128xf32>
    tpu.vector_store %arg4[%c0_5, %c0_6], %6 {strides = array<i32>} : memref<8x128xf32, #tpu.memory_space<vmem>>, vector<8x128xf32>,
    return
  }
  func.func @transform_0(%arg0: i32) -> (i32, i32) {
    %c0_i32 = arith.constant 0 : i32
    %c0_i32_0 = arith.constant 0 : i32
    return %arg0, %c0_i32 : i32, i32
  }
  func.func @transform_1(%arg0: i32) -> (i32, i32) {
    %c0_i32 = arith.constant 0 : i32
    %c0_i32_0 = arith.constant 0 : i32
    %c0_i32_1 = arith.constant 0 : i32
    return %c0_i32, %c0_i32_0 : i32, i32
  }
  func.func @transform_2(%arg0: i32) -> (i32, i32) {
    %c0_i32 = arith.constant 0 : i32
    %c0_i32_0 = arith.constant 0 : i32
    %c0_i32_1 = arith.constant 0 : i32
    return %c0_i32, %c0_i32_0 : i32, i32
  }
  func.func @transform_3(%arg0: i32) -> (i32, i32) {
    %c0_i32 = arith.constant 0 : i32
    %c0_i32_0 = arith.constant 0 : i32
    return %arg0, %c0_i32 : i32, i32
  }
}

</mosaic_0001>

<bundles_post_ra>
// kernel: tile.23
= control target key start
LH: loop header
LB: loop body
LE: loop exit
PB: predicated region body
PF: predicated region fallthrough
CT: control target
= control target key end

     0   :  { %s28_s0 = inlined_call_operand.vmem [shape: f32[8], index: 0, kind: input, shape index: {}]   ;;  %s29_s1 = inlined_call_operand.vmem [shape: f32[16,8], index: 1, kind: output, shape index: {}]  }
   0x1   :  { %v4_v0 = vld [vmem:[%s28_s0] ss:$0 sm:$0xff] }
   0x2   :  { %5 = vst [vmem:[%s29_s1] sm:$0xff] %v4_v0  ;;  %8 = vst [vmem:[%s29_s1 + $0x8] sm:$0xff] %v4_v0 }

// kernel: tile.24
= control target key start
LH: loop header
LB: loop body
LE: loop exit
PB: predicated region body
PF: predicated region fallthrough
CT: control target
= control target key end

     0   :  { %s133_s10 = smov 120   ;;  %s134_s11 = smov 104   ;;  %vm3_vm0 = vcmask 64512   ;;  %vm9_vm1 = vcmask 1048512   ;;  %vm15_vm2 = vcmask 982912   ;;  %vm21_vm3 = vcmask 917312   ;;  %s209_s0 = inlined_call_operand.vmem [shape: f32[16,8], index: 0, kind: input, shape index: {}]   ;;  %s210_s1 = inlined_call_operand.vmem [shape: f32[1,128], index: 1, kind: output, shape index: {}]  }
   0x1   :  { %v103_v0 = vld [vmem:[%s209_s0 + $0xf] sm:$0x1]   ;;  %v105_v1 = vld [vmem:[%s209_s0 + $0xd] sm:$0x1]   ;;  %v104_v2 = vld [vmem:[%s209_s0 + $0xe] sm:$0x1]  }
   0x2   :  { %7 = vrot.lane.b32.xlu0 %v103_v0, %s133_s10  ;;  %19 = vrot.lane.b32.xlu1 %v105_v1, %s134_s11  ;;  %v106_v3 = vld [vmem:[%s209_s0 + $0xc] sm:$0x1]   ;;  %s135_s16 = smov 112   ;;  %s136_s17 = smov 96   ;;  %v107_v4 = vld [vmem:[%s209_s0 + $0xb] sm:$0x1]  }
   0x3   :  { %v108_v5 = vld [vmem:[%s209_s0 + $0xa] sm:$0x1]   ;;  %v2_v6 = vld [vmem:[%s209_s0] sm:$0x1]   ;;  %s137_s24 = smov 88   ;;  %s138_s25 = smov 80  }
   0x4   :  { %4 = vst.msk [vmem:[#allocation0] sm:$0x1] %vm3_vm0, %v2_v6   ;;  %v109_v7 = vld [vmem:[%s209_s0 + $0x9] sm:$0x1]   ;;  %v110_v8 = vld [vmem:[%s209_s0 + $0x8] sm:$0x1]  }
   0x5   :  { %s139_s30 = smov 72   ;;  %s140_s2 = smov 64   ;;  %v111_v9 = vld [vmem:[%s209_s0 + $0x7] sm:$0x1]   ;;  %v112_v10 = vld [vmem:[%s209_s0 + $0x6] sm:$0x1]  }
   0x6   :  { %13 = vrot.lane.b32.xlu0 %v104_v2, %s135_s16  ;;  %25 = vrot.lane.b32.xlu1 %v106_v3, %s136_s17  ;;  %s141_s7 = smov 56   ;;  %s142_s8 = smov 48   ;;  %v113_v11 = vld [vmem:[%s209_s0 + $0x5] sm:$0x1]   ;;  %v114_v12 = vld [vmem:[%s209_s0 + $0x4] sm:$0x1]  }
   0x7   :  { %s143_s13 = smov 40   ;;  %s144_s14 = smov 32   ;;  %v115_v13 = vld [vmem:[%s209_s0 + $0x3] sm:$0x1]   ;;  %v116_v14 = vld [vmem:[%s209_s0 + $0x2] sm:$0x1]  }
   0x8   :  { %s145_s19 = smov 24   ;;  %s146_s20 = smov 16   ;;  %v117_v15 = vld [vmem:[%s209_s0 + $0x1] sm:$0x1]   ;;  %vm27_vm4 = vcmask 851712   ;;  %vm33_vm5 = vcmask 786112  }
   0x9   :  { %s147_s0 = smov 8   ;;  %vm39_vm6 = vcmask 720512   ;;  %vm45_vm7 = vcmask 654912   ;;  %vm51_vm8 = vcmask 589312   ;;  %vm57_vm9 = vcmask 523712  }
   0xa   :  { %31 = vrot.lane.b32.xlu0 %v107_v4, %s137_s24  ;;  %37 = vrot.lane.b32.xlu1 %v108_v5, %s138_s25  ;;  %vm63_vm10 = vcmask 458112   ;;  %vm69_vm11 = vcmask 392512   ;;  %vm75_vm12 = vcmask 326912   ;;  %vm81_vm13 = vcmask 261312  }
   0xb   :  { %vm87_vm14 = vcmask 195712   ;;  %vm93_vm15 = vcmask 130112  }
   0xe   :  { %43 = vrot.lane.b32.xlu0 %v109_v7, %s139_s30  ;;  %49 = vrot.lane.b32.xlu1 %v110_v8, %s140_s2 }
  0x12   :  { %55 = vrot.lane.b32.xlu0 %v111_v9, %s141_s7  ;;  %61 = vrot.lane.b32.xlu1 %v112_v10, %s142_s8 }
  0x16   :  { %67 = vrot.lane.b32.xlu0 %v113_v11, %s143_s13  ;;  %73 = vrot.lane.b32.xlu1 %v114_v12, %s144_s14 }
  0x1a   :  { %79 = vrot.lane.b32.xlu0 %v115_v13, %s145_s19  ;;  %85 = vrot.lane.b32.xlu1 %v116_v14, %s146_s20 }
  0x1e   :  { %91 = vrot.lane.b32.xlu0 %v117_v15, %s147_s0 }
  0x74   :  { %v8_v16 = vpop.permute.xlu0 %7   ;;  %v20_v17 = vpop.permute.xlu1 %19  }
  0x75   :  { %10 = vst.msk [vmem:[#allocation0] sm:$0x1] %vm9_vm1, %v8_v16  }
  0x78   :  { %v14_v18 = vpop.permute.xlu0 %13   ;;  %v26_v19 = vpop.permute.xlu1 %25  }
  0x79   :  { %16 = vst.msk [vmem:[#allocation0] sm:$0x1] %vm15_vm2, %v14_v18  }
  0x7a   :  { %22 = vst.msk [vmem:[#allocation0] sm:$0x1] %vm21_vm3, %v20_v17  }
  0x7b   :  { %28 = vst.msk [vmem:[#allocation0] sm:$0x1] %vm27_vm4, %v26_v19  }
  0x7c   :  { %v32_v20 = vpop.permute.xlu0 %31   ;;  %v38_v21 = vpop.permute.xlu1 %37  }
  0x7d   :  { %34 = vst.msk [vmem:[#allocation0] sm:$0x1] %vm33_vm5, %v32_v20  }
  0x7e   :  { %40 = vst.msk [vmem:[#allocation0] sm:$0x1] %vm39_vm6, %v38_v21  }
  0x80   :  { %v44_v22 = vpop.permute.xlu0 %43   ;;  %v50_v23 = vpop.permute.xlu1 %49  }
  0x81   :  { %46 = vst.msk [vmem:[#allocation0] sm:$0x1] %vm45_vm7, %v44_v22  }
  0x82   :  { %52 = vst.msk [vmem:[#allocation0] sm:$0x1] %vm51_vm8, %v50_v23  }
  0x84   :  { %v56_v24 = vpop.permute.xlu0 %55   ;;  %v62_v25 = vpop.permute.xlu1 %61  }
  0x85   :  { %58 = vst.msk [vmem:[#allocation0] sm:$0x1] %vm57_vm9, %v56_v24  }
  0x86   :  { %64 = vst.msk [vmem:[#allocation0] sm:$0x1] %vm63_vm10, %v62_v25  }
  0x88   :  { %v68_v26 = vpop.permute.xlu0 %67   ;;  %v74_v27 = vpop.permute.xlu1 %73  }
  0x89   :  { %70 = vst.msk [vmem:[#allocation0] sm:$0x1] %vm69_vm11, %v68_v26  }
  0x8a   :  { %76 = vst.msk [vmem:[#allocation0] sm:$0x1] %vm75_vm12, %v74_v27  }
  0x8c   :  { %v80_v28 = vpop.permute.xlu0 %79   ;;  %v86_v29 = vpop.permute.xlu1 %85  }
  0x8d   :  { %82 = vst.msk [vmem:[#allocation0] sm:$0x1] %vm81_vm13, %v80_v28  }
  0x8e   :  { %88 = vst.msk [vmem:[#allocation0] sm:$0x1] %vm87_vm14, %v86_v29  }
  0x90   :  { %v92_v30 = vpop.permute.xlu0 %91  }
  0x91   :  { %94 = vst.msk [vmem:[#allocation0] sm:$0x1] %vm93_vm15, %v92_v30  }
  0x98   :  { %v99_v31 = vld [vmem:[#allocation0] sm:$0x1] }
  0x99   :  { %102 = vst [vmem:[%s210_s1] sm:$0x1] %v99_v31 }

// kernel: downsampleblock_forward.5
= control target key start
LH: loop header
LB: loop body
LE: loop exit
PB: predicated region body
PF: predicated region fallthrough
CT: control target
= control target key end

     0   :  { %s71_s0 = inlined_call_operand.vmem [shape: f32[8,128], index: 0, kind: input, shape index: {}]   ;;  %s72_s1 = inlined_call_operand.vmem [shape: f32[1,128], index: 1, kind: input, shape index: {}]   ;;  %s73_s2 = inlined_call_operand.vmem [shape: f32[1,128], index: 2, kind: input, shape index: {}]   ;;  %s74_s3 = inlined_call_operand.vmem [shape: f32[8,128], index: 3, kind: output, shape index: {}]  }
   0x1   :  { %v14_v0 = vld [vmem:[%s71_s0] sm:$0xff] }
   0x2   :  { %v37_v1 = vld [vmem:[%s72_s1] ss:$0 sm:$0xff] }
   0x3   :  { %v38_v2 = vld [vmem:[%s73_s2] ss:$0 sm:$0xff]  ;;  %v22_v3 = vmul.f32 %v37_v1, %v14_v0 }
   0x5   :  { %v30_v4 = vadd.f32 %v38_v2, %v22_v3 }
   0x7   :  { %v31_v5 = vmax.f32 %v30_v4, 0.0 }
   0x9   :  { %32 = vst [vmem:[%s74_s3] sm:$0xff] %v31_v5 }

// kernel: downsampleblock_forward.4
= control target key start
LH: loop header
LB: loop body
LE: loop exit
PB: predicated region body
PF: predicated region fallthrough
CT: control target
= control target key end

     0   :  { %vm102_vm0 = vcmask 1043456   ;;  %vm53_vm1 = vcmask 883712   ;;  %vm251_vm2 = vcmask 64512   ;;  %s772_s1 = inlined_call_operand.vmem [shape: f32[108,8], index: 1, kind: input, shape index: {}]   ;;  %s773_s0 = inlined_call_operand.vmem [shape: f32[128,108], index: 0, kind: input, shape index: {}]   ;;  %s774_s2 = inlined_call_operand.vmem [shape: f32[1,8], index: 2, kind: input, shape index: {}]   ;;  %s775_s3 = inlined_call_operand.vmem [shape: f32[128,8], index: 3, kind: output, shape index: {0}]   ;;  %s776_s4 = inlined_call_operand.vmem [shape: f32[1,8,8], index: 4, kind: output, shape index: {1}]  }
   0x1   :  { %v45_v0 = vld [vmem:[%s772_s1 + $0x68] sm:$0xf]  ;;  %v44_v1 = vld [vmem:[%s772_s1 + $0x60] sm:$0xff]  ;;  %v43_v2 = vld [vmem:[%s772_s1 + $0x58] sm:$0xff] }
   0x2   :  { %422 = vmatprep.subr.msk.mxu0 %vm102_vm0, %v45_v0  ;;  %474 = vmatprep.subr.msk.mxu1 %vm102_vm0, %v45_v0  ;;  %v42_v3 = vld [vmem:[%s772_s1 + $0x50] sm:$0xff]  ;;  %v41_v4 = vld [vmem:[%s772_s1 + $0x48] sm:$0xff]  ;;  %v40_v5 = vld [vmem:[%s772_s1 + $0x40] sm:$0xff] }
   0x3   :  { %423 = vmatpush3.msk.msra.mxu0 %vm102_vm0, %v45_v0  ;;  %488 = vmatpush3.msk.msra.mxu1 %vm102_vm0, %v45_v0  ;;  %v39_v6 = vld [vmem:[%s772_s1 + $0x38] sm:$0xff]  ;;  %v38_v7 = vld [vmem:[%s772_s1 + $0x30] sm:$0xff]  ;;  %v16_v8 = vld [vmem:[%s773_s0] sm:$0xff] }
   0x4   :  { %424 = vmatprep.subr.mxu0 %v44_v1  ;;  %475 = vmatprep.subr.mxu1 %v44_v1  ;;  %v37_v9 = vld [vmem:[%s772_s1 + $0x28] sm:$0xff]  ;;  %v36_v10 = vld [vmem:[%s772_s1 + $0x20] sm:$0xff]  ;;  %v35_v11 = vld [vmem:[%s772_s1 + $0x18] sm:$0xff] }
   0x5   :  { %425 = vmatpush3.msra.mxu0 %v44_v1  ;;  %489 = vmatpush3.msra.mxu1 %v44_v1  ;;  %v34_v12 = vld [vmem:[%s772_s1 + $0x10] sm:$0xff]  ;;  %v33_v13 = vld [vmem:[%s772_s1 + $0x8] sm:$0xff]  ;;  %v32_v14 = vld [vmem:[%s772_s1] sm:$0xff] }
   0x6   :  { %426 = vmatprep.subr.mxu0 %v43_v2  ;;  %476 = vmatprep.subr.mxu1 %v43_v2  ;;  %v17_v15 = vld [vmem:[%s773_s0 + $0x8] sm:$0xff]  ;;  %v18_v16 = vld [vmem:[%s773_s0 + $0x10] sm:$0xff]  ;;  %v24_v17 = vld [vmem:[%s773_s0 + $0x40] sm:$0xff] }
   0x7   :  { %427 = vmatpush3.msra.mxu0 %v43_v2  ;;  %490 = vmatpush3.msra.mxu1 %v43_v2  ;;  %v25_v18 = vld [vmem:[%s773_s0 + $0x48] sm:$0xff]  ;;  %v26_v19 = vld [vmem:[%s773_s0 + $0x50] sm:$0xff]  ;;  %v19_v20 = vld [vmem:[%s773_s0 + $0x18] sm:$0xff] }
   0x8   :  { %428 = vmatprep.subr.mxu0 %v42_v3  ;;  %477 = vmatprep.subr.mxu1 %v42_v3  ;;  %v20_v21 = vld [vmem:[%s773_s0 + $0x20] sm:$0xff]  ;;  %v27_v22 = vld [vmem:[%s773_s0 + $0x58] sm:$0xff]  ;;  %v21_v24 = vld [vmem:[%s773_s0 + $0x28] sm:$0xff] }
   0x9   :  { %429 = vmatpush3.msra.mxu0 %v42_v3  ;;  %491 = vmatpush3.msra.mxu1 %v42_v3  ;;  %v28_v23 = vld [vmem:[%s773_s0 + $0x60] sm:$0xff]  ;;  %v22_v25 = vld [vmem:[%s773_s0 + $0x30] sm:$0xff]  ;;  %v29_v26 = vld [vmem:[%s773_s0 + $0x68] sm:$0xff] }
   0xa   :  { %430 = vmatprep.subr.mxu0 %v41_v4  ;;  %478 = vmatprep.subr.mxu1 %v41_v4  ;;  %v30_v27 = vld [vmem:[%s773_s0 + $0x70] sm:$0xff]  ;;  %v23_v28 = vld [vmem:[%s773_s0 + $0x38] sm:$0xff]  ;;  %v636_v30 = vld [vmem:[%s774_s2] ss:$0 sm:$0xff] }
   0xb   :  { %431 = vmatpush3.msra.mxu0 %v41_v4  ;;  %492 = vmatpush3.msra.mxu1 %v41_v4  ;;  %v31_v29 = vld [vmem:[%s773_s0 + $0x78] sm:$0xff] }
   0xc   :  { %432 = vmatprep.subr.mxu0 %v40_v5  ;;  %479 = vmatprep.subr.mxu1 %v40_v5 }
   0xd   :  { %433 = vmatpush3.msra.mxu0 %v40_v5  ;;  %493 = vmatpush3.msra.mxu1 %v40_v5 }
   0xe   :  { %434 = vmatprep.subr.mxu0 %v39_v6  ;;  %480 = vmatprep.subr.mxu1 %v39_v6 }
   0xf   :  { %435 = vmatpush3.msra.mxu0 %v39_v6  ;;  %494 = vmatpush3.msra.mxu1 %v39_v6 }
  0x10   :  { %436 = vmatprep.subr.mxu0 %v38_v7  ;;  %450 = vmatprep.mubr.msk.f32.mxu0 %vm53_vm1, %v16_v8 }
  0x11   :  { %437 = vmatpush3.msra.mxu0 %v38_v7  ;;  %481 = vmatprep.subr.mxu1 %v38_v7 }
  0x12   :  { %438 = vmatprep.subr.mxu0 %v37_v9  ;;  %495 = vmatpush3.msra.mxu1 %v38_v7 }
  0x13   :  { %439 = vmatpush3.msra.mxu0 %v37_v9  ;;  %482 = vmatprep.subr.mxu1 %v37_v9 }
  0x14   :  { %440 = vmatprep.subr.mxu0 %v36_v10  ;;  %496 = vmatpush3.msra.mxu1 %v37_v9 }
  0x15   :  { %441 = vmatpush3.msra.mxu0 %v36_v10  ;;  %483 = vmatprep.subr.mxu1 %v36_v10 }
  0x16   :  { %442 = vmatprep.subr.mxu0 %v35_v11  ;;  %497 = vmatpush3.msra.mxu1 %v36_v10 }
  0x17   :  { %443 = vmatpush3.msra.mxu0 %v35_v11  ;;  %484 = vmatprep.subr.mxu1 %v35_v11 }
  0x18   :  { %444 = vmatprep.subr.mxu0 %v34_v12  ;;  %498 = vmatpush3.msra.mxu1 %v35_v11 }
  0x19   :  { %445 = vmatpush3.msra.mxu0 %v34_v12  ;;  %485 = vmatprep.subr.mxu1 %v34_v12 }
  0x1a   :  { %446 = vmatprep.subr.mxu0 %v33_v13  ;;  %499 = vmatpush3.msra.mxu1 %v34_v12 }
  0x1b   :  { %447 = vmatpush3.msra.mxu0 %v33_v13  ;;  %486 = vmatprep.subr.mxu1 %v33_v13 }
  0x1c   :  { %448 = vmatprep.subr.mxu0 %v32_v14  ;;  %500 = vmatpush3.msra.mxu1 %v33_v13 }
  0x1d   :  { %449 = vmatpush3.msra.mxu0 %v32_v14  ;;  %487 = vmatprep.subr.mxu1 %v32_v14 }
  0x1e   :  { %451 = vmatmul.mubr.msk.f32.vlgmr.msra.gmra.mxu0 %vm53_vm1, %v17_v15  ;;  %501 = vmatpush3.msra.mxu1 %v32_v14 }
  0x1f   :  { %453 = vmatprep.mubr.msk.f32.mxu0 %vm53_vm1, %v18_v16  ;;  %462 = vmatprep.mubr.msk.f32.mxu1 %vm53_vm1, %v24_v17 }
  0x20   :  { %463 = vmatmul.mubr.msk.f32.vlgmr.msra.gmra.mxu1 %vm53_vm1, %v25_v18 }
  0x21   :  { %465 = vmatprep.mubr.msk.f32.mxu1 %vm53_vm1, %v26_v19 }
  0x22   :  { %454 = vmatmul.mubr.msk.f32.gmra.mxu0 %vm53_vm1, %v19_v20 }
  0x23   :  { %456 = vmatprep.mubr.msk.f32.mxu0 %vm53_vm1, %v20_v21 }
  0x24   :  { %466 = vmatmul.mubr.msk.f32.gmra.mxu1 %vm53_vm1, %v27_v22 }
  0x25   :  { %468 = vmatprep.mubr.msk.f32.mxu1 %vm53_vm1, %v28_v23 }
  0x26   :  { %457 = vmatmul.mubr.msk.f32.gmra.mxu0 %vm53_vm1, %v21_v24 }
  0x27   :  { %459 = vmatprep.mubr.msk.f32.mxu0 %vm53_vm1, %v22_v25 }
  0x28   :  { %469 = vmatmul.mubr.msk.f32.gmra.mxu1 %vm53_vm1, %v29_v26 }
  0x29   :  { %471 = vmatprep.mubr.msk.f32.mxu1 %vm53_vm1, %v30_v27 }
  0x2a   :  { %460 = vmatmul.mubr.msk.f32.gmra.mxu0 %vm53_vm1, %v23_v28 }
  0x2c   :  { %472 = vmatmul.mubr.msk.f32.gmra.mxu1 %vm53_vm1, %v31_v29 }
  0xde   :  { %v452_v31 = vpop.f32.mrf.mxu0 }
  0xdf   :  { %v178_v32 = vadd.f32 %v452_v31, %v636_v30 }
  0xe0   :  { %v172_v33 = vpop.f32.mrf.mxu0  ;;  %v464_v34 = vpop.f32.mrf.mxu1 }
  0xe1   :  { %253 = vst.msk [vmem:[%s775_s3 + $0x8] sm:$0xff] %vm251_vm2, %v178_v32  ;;  %v173_v35 = vadd.f32 %v636_v30, %v172_v33  ;;  %v645_v36 = vadd.f32 %v464_v34, %v636_v30  ;;  %v306_v37 = vmul.f32 %v178_v32, %v178_v32  ;;  %v269_v46 = vsel %vm251_vm2, %v178_v32, 0.0 }
  0xe2   :  { %v455_v38 = vpop.f32.mrf.mxu0  ;;  %v212_v39 = vpop.f32.mrf.mxu1 }
  0xe3   :  { %252 = vst.msk [vmem:[%s775_s3] sm:$0xff] %vm251_vm2, %v173_v35  ;;  %v268_v40 = vsel %vm251_vm2, %v173_v35, 0.0  ;;  %v305_v41 = vmul.f32 %v173_v35, %v173_v35  ;;  %v188_v42 = vadd.f32 %v455_v38, %v636_v30  ;;  %261 = vst.msk [vmem:[%s775_s3 + $0x48] sm:$0xff] %vm251_vm2, %v645_v36  ;;  %v659_v44 = vadd.f32 %v636_v30, %v212_v39 }
  0xe4   :  { %v182_v43 = vpop.f32.mrf.mxu0  ;;  %v467_v45 = vpop.f32.mrf.mxu1  ;;  %v322_v49 = vsel %vm251_vm2, %v306_v37, 0.0  ;;  %v270_v50 = vadd.f32 %v269_v46, %v268_v40  ;;  %v314_v39 = vmul.f32 %v645_v36, %v645_v36 }
  0xe5   :  { %v321_v47 = vsel %vm251_vm2, %v305_v41, 0.0  ;;  %255 = vst.msk [vmem:[%s775_s3 + $0x18] sm:$0xff] %vm251_vm2, %v188_v42  ;;  %v183_v48 = vadd.f32 %v636_v30, %v182_v43  ;;  %260 = vst.msk [vmem:[%s775_s3 + $0x40] sm:$0xff] %vm251_vm2, %v659_v44  ;;  %v308_v53 = vmul.f32 %v188_v42, %v188_v42  ;;  %v681_v60 = vadd.f32 %v467_v45, %v636_v30 }
  0xe6   :  { %v458_v51 = vpop.f32.mrf.mxu0  ;;  %v222_v52 = vpop.f32.mrf.mxu1  ;;  %v323_v57 = vadd.f32 %v322_v49, %v321_v47  ;;  %v273_v63 = vsel %vm251_vm2, %v188_v42, 0.0  ;;  %v313_v32 = vmul.f32 %v659_v44, %v659_v44  ;;  %v283_v40 = vsel %vm251_vm2, %v659_v44, 0.0 }
  0xe7   :  { %254 = vst.msk [vmem:[%s775_s3 + $0x10] sm:$0xff] %vm251_vm2, %v183_v48  ;;  %v271_v54 = vsel %vm251_vm2, %v183_v48, 0.0  ;;  %v307_v55 = vmul.f32 %v183_v48, %v183_v48  ;;  %v198_v56 = vadd.f32 %v458_v51, %v636_v30  ;;  %v223_v61 = vadd.f32 %v636_v30, %v222_v52  ;;  %263 = vst.msk [vmem:[%s775_s3 + $0x58] sm:$0xff] %vm251_vm2, %v681_v60 }
  0xe8   :  { %v272_v58 = vadd.f32 %v271_v54, %v270_v50  ;;  %v192_v59 = vpop.f32.mrf.mxu0  ;;  %v470_v62 = vpop.f32.mrf.mxu1  ;;  %v326_v7 = vsel %vm251_vm2, %v308_v53, 0.0  ;;  %v336_v43 = vsel %vm251_vm2, %v313_v32, 0.0  ;;  %v338_v47 = vsel %vm251_vm2, %v314_v39, 0.0 }
  0xe9   :  { %v324_v0 = vsel %vm251_vm2, %v307_v55, 0.0  ;;  %257 = vst.msk [vmem:[%s775_s3 + $0x28] sm:$0xff] %vm251_vm2, %v198_v56  ;;  %v193_v1 = vadd.f32 %v636_v30, %v192_v59  ;;  %v310_v3 = vmul.f32 %v198_v56, %v198_v56  ;;  %262 = vst.msk [vmem:[%s775_s3 + $0x50] sm:$0xff] %vm251_vm2, %v223_v61  ;;  %v277_v15 = vsel %vm251_vm2, %v198_v56, 0.0 }
  0xea   :  { %v325_v2 = vadd.f32 %v324_v0, %v323_v57  ;;  %v274_v4 = vadd.f32 %v273_v63, %v272_v58  ;;  %v461_v5 = vpop.f32.mrf.mxu0  ;;  %v232_v6 = vpop.f32.mrf.mxu1  ;;  %v238_v21 = vadd.f32 %v470_v62, %v636_v30  ;;  %v315_v45 = vmul.f32 %v223_v61, %v223_v61 }
  0xeb   :  { %256 = vst.msk [vmem:[%s775_s3 + $0x20] sm:$0xff] %vm251_vm2, %v193_v1  ;;  %v275_v8 = vsel %vm251_vm2, %v193_v1, 0.0  ;;  %v309_v9 = vmul.f32 %v193_v1, %v193_v1  ;;  %v208_v10 = vadd.f32 %v461_v5, %v636_v30  ;;  %v330_v18 = vsel %vm251_vm2, %v310_v3, 0.0 }
  0xec   :  { %v276_v11 = vadd.f32 %v275_v8, %v274_v4  ;;  %v327_v12 = vadd.f32 %v326_v7, %v325_v2  ;;  %v202_v13 = vpop.f32.mrf.mxu0  ;;  %v473_v14 = vpop.f32.mrf.mxu1  ;;  %v233_v25 = vadd.f32 %v636_v30, %v232_v6  ;;  %265 = vst.msk [vmem:[%s775_s3 + $0x68] sm:$0xff] %vm251_vm2, %v238_v21  ;;  %v316_v48 = vmul.f32 %v681_v60, %v681_v60 }
  0xed   :  { %v328_v16 = vsel %vm251_vm2, %v309_v9, 0.0  ;;  %259 = vst.msk [vmem:[%s775_s3 + $0x38] sm:$0xff] %vm251_vm2, %v208_v10  ;;  %v203_v17 = vadd.f32 %v636_v30, %v202_v13  ;;  %v312_v22 = vmul.f32 %v208_v10, %v208_v10  ;;  %v281_v29 = vsel %vm251_vm2, %v208_v10, 0.0 }
  0xee   :  { %v329_v19 = vadd.f32 %v328_v16, %v327_v12  ;;  %v278_v20 = vadd.f32 %v277_v15, %v276_v11  ;;  %v242_v26 = vpop.f32.mrf.mxu1  ;;  %264 = vst.msk [vmem:[%s775_s3 + $0x60] sm:$0xff] %vm251_vm2, %v233_v25  ;;  %v248_v35 = vadd.f32 %v473_v14, %v636_v30  ;;  %v287_v49 = vsel %vm251_vm2, %v223_v61, 0.0 }
  0xef   :  { %258 = vst.msk [vmem:[%s775_s3 + $0x30] sm:$0xff] %vm251_vm2, %v203_v17  ;;  %v279_v23 = vsel %vm251_vm2, %v203_v17, 0.0  ;;  %v311_v24 = vmul.f32 %v203_v17, %v203_v17  ;;  %v243_v37 = vadd.f32 %v636_v30, %v242_v26  ;;  %v334_v38 = vsel %vm251_vm2, %v312_v22, 0.0 }
  0xf0   :  { %v280_v27 = vadd.f32 %v279_v23, %v278_v20  ;;  %v331_v28 = vadd.f32 %v330_v18, %v329_v19  ;;  %267 = vst.msk [vmem:[%s775_s3 + $0x78] sm:$0xff] %vm251_vm2, %v248_v35  ;;  %v285_v30 = vsel %vm251_vm2, %v645_v36, 0.0  ;;  %v289_v52 = vsel %vm251_vm2, %v681_v60, 0.0 }
  0xf1   :  { %v332_v31 = vsel %vm251_vm2, %v311_v24, 0.0  ;;  %266 = vst.msk [vmem:[%s775_s3 + $0x70] sm:$0xff] %vm251_vm2, %v243_v37  ;;  %v340_v53 = vsel %vm251_vm2, %v315_v45, 0.0  ;;  %v317_v36 = vmul.f32 %v233_v25, %v233_v25  ;;  %v342_v56 = vsel %vm251_vm2, %v316_v48, 0.0 }
  0xf2   :  { %v333_v33 = vadd.f32 %v332_v31, %v331_v28  ;;  %v282_v34 = vadd.f32 %v281_v29, %v280_v27  ;;  %v318_v57 = vmul.f32 %v238_v21, %v238_v21  ;;  %v291_v58 = vsel %vm251_vm2, %v233_v25, 0.0 }
  0xf3   :  { %v293_v63 = vsel %vm251_vm2, %v238_v21, 0.0  ;;  %v344_v61 = vsel %vm251_vm2, %v317_v36, 0.0  ;;  %v319_v0 = vmul.f32 %v243_v37, %v243_v37  ;;  %v320_v3 = vmul.f32 %v248_v35, %v248_v35 }
  0xf4   :  { %v284_v41 = vadd.f32 %v283_v40, %v282_v34  ;;  %v335_v42 = vadd.f32 %v334_v38, %v333_v33  ;;  %v346_v60 = vsel %vm251_vm2, %v318_v57, 0.0  ;;  %v295_v4 = vsel %vm251_vm2, %v243_v37, 0.0 }
  0xf5   :  { %v297_v7 = vsel %vm251_vm2, %v248_v35, 0.0  ;;  %v348_v8 = vsel %vm251_vm2, %v319_v0, 0.0  ;;  %v350_v11 = vsel %vm251_vm2, %v320_v3, 0.0  ;;  %v358_v16 = vlaneseq }
  0xf6   :  { %v337_v46 = vadd.f32 %v336_v43, %v335_v42  ;;  %v286_v44 = vadd.f32 %v285_v30, %v284_v41 }
  0xf7   :  { %v359_v21 = vshrl.u32 %v358_v16, 7 }
  0xf8   :  { %v288_v50 = vadd.f32 %v287_v49, %v286_v44  ;;  %v339_v51 = vadd.f32 %v338_v47, %v337_v46 }
  0xf9   :  { %vm360_vm3 = vcmp.eq.s32.totalorder %v359_v21, 0  ;;  %vm362_vm4 = vcmp.eq.s32.totalorder %v359_v21, 1 }
  0xfa   :  { %v341_v54 = vadd.f32 %v340_v53, %v339_v51  ;;  %v290_v55 = vadd.f32 %v289_v52, %v288_v50 }
  0xfc   :  { %v292_v59 = vadd.f32 %v291_v58, %v290_v55  ;;  %v343_v62 = vadd.f32 %v342_v56, %v341_v54 }
  0xfe   :  { %v345_v1 = vadd.f32 %v344_v61, %v343_v62  ;;  %v294_v2 = vadd.f32 %v293_v63, %v292_v59 }
 0x100   :  { %v296_v5 = vadd.f32 %v295_v4, %v294_v2  ;;  %v347_v6 = vadd.f32 %v346_v60, %v345_v1 }
 0x102   :  { %v298_v9 = vadd.f32 %v297_v7, %v296_v5  ;;  %v349_v10 = vadd.f32 %v348_v8, %v347_v6 }
 0x104   :  { %v299_v12 = vrot.slane %v298_v9, 4  ;;  %v351_v13 = vadd.f32 %v350_v11, %v349_v10 }
 0x106   :  { %v300_v14 = vadd.f32 %v299_v12, %v298_v9  ;;  %v352_v15 = vrot.slane %v351_v13, 4 }
 0x108   :  { %v301_v17 = vrot.slane %v300_v14, 2  ;;  %v353_v18 = vadd.f32 %v352_v15, %v351_v13 }
 0x10a   :  { %v302_v19 = vadd.f32 %v301_v17, %v300_v14  ;;  %v354_v20 = vrot.slane %v353_v18, 2 }
 0x10c   :  { %v303_v22 = vrot.slane %v302_v19, 1  ;;  %v355_v23 = vadd.f32 %v354_v20, %v353_v18 }
 0x10e   :  { %v304_v24 = vadd.f32 %v303_v22, %v302_v19  ;;  %v356_v25 = vrot.slane %v355_v23, 1 }
 0x110   :  { %v357_v26 = vadd.f32 %v356_v25, %v355_v23  ;;  %v361_v27 = vsel %vm360_vm3, %v304_v24, 0.0 }
 0x112   :  { %v363_v28 = vsel %vm362_vm4, %v357_v26, 0.0 }
 0x113   :  { %v364_v29 = vadd.f32 %v363_v28, %v361_v27 }
 0x115   :  { %365 = vst.msk [vmem:[%s776_s4] sm:$0xff] %vm251_vm2, %v364_v29 }

// kernel: downsampleblock_forward.6
= control target key start
LH: loop header
LB: loop body
LE: loop exit
PB: predicated region body
PF: predicated region fallthrough
CT: control target
= control target key end

     0   :  { %v471_v0 = vmov 0.0   ;;  %vm82_vm0 = vcmask 719872   ;;  %vm276_vm1 = vcmask 64512   ;;  %s901_s1 = inlined_call_operand.vmem [shape: f32[216,8], index: 1, kind: input, shape index: {}]   ;;  %s902_s0 = inlined_call_operand.vmem [shape: f32[128,216], index: 0, kind: input, shape index: {}]   ;;  %s903_s2 = inlined_call_operand.vmem [shape: f32[1,8], index: 2, kind: input, shape index: {}]   ;;  %s904_s3 = inlined_call_operand.vmem [shape: f32[128,8], index: 3, kind: output, shape index: {0}]   ;;  %s905_s4 = inlined_call_operand.vmem [shape: f32[1,8,8], index: 4, kind: output, shape index: {1}]  }
   0x1   :  { %131 = vmatprep.subr.mxu0 %v471_v0  ;;  %v63_v1 = vld [vmem:[%s901_s1 + $0x78] sm:$0xff]  ;;  %v62_v2 = vld [vmem:[%s901_s1 + $0x70] sm:$0xff]  ;;  %416 = vmatprep.subr.mxu1 %v471_v0  ;;  %v61_v3 = vld [vmem:[%s901_s1 + $0x68] sm:$0xff] }
   0x2   :  { %132 = vmatpush1.msra.mxu0 %v63_v1  ;;  %443 = vmatpush1.msra.mxu1 %v63_v1  ;;  %v60_v4 = vld [vmem:[%s901_s1 + $0x60] sm:$0xff]  ;;  %v59_v5 = vld [vmem:[%s901_s1 + $0x58] sm:$0xff]  ;;  %v58_v6 = vld [vmem:[%s901_s1 + $0x50] sm:$0xff] }
   0x3   :  { %133 = vmatprep.subr.mxu0 %v471_v0  ;;  %417 = vmatprep.subr.mxu1 %v471_v0  ;;  %v57_v7 = vld [vmem:[%s901_s1 + $0x48] sm:$0xff]  ;;  %v56_v8 = vld [vmem:[%s901_s1 + $0x40] sm:$0xff]  ;;  %v55_v9 = vld [vmem:[%s901_s1 + $0x38] sm:$0xff] }
   0x4   :  { %134 = vmatpush1.msra.mxu0 %v62_v2  ;;  %444 = vmatpush1.msra.mxu1 %v62_v2  ;;  %v54_v10 = vld [vmem:[%s901_s1 + $0x30] sm:$0xff]  ;;  %v53_v11 = vld [vmem:[%s901_s1 + $0x28] sm:$0xff]  ;;  %v52_v12 = vld [vmem:[%s901_s1 + $0x20] sm:$0xff] }
   0x5   :  { %135 = vmatprep.subr.mxu0 %v471_v0  ;;  %418 = vmatprep.subr.mxu1 %v471_v0  ;;  %v51_v13 = vld [vmem:[%s901_s1 + $0x18] sm:$0xff]  ;;  %v50_v14 = vld [vmem:[%s901_s1 + $0x10] sm:$0xff]  ;;  %v49_v15 = vld [vmem:[%s901_s1 + $0x8] sm:$0xff] }
   0x6   :  { %136 = vmatpush1.msra.mxu0 %v61_v3  ;;  %445 = vmatpush1.msra.mxu1 %v61_v3  ;;  %v48_v16 = vld [vmem:[%s901_s1] sm:$0xff]  ;;  %v74_v17 = vld [vmem:[%s901_s1 + $0xd0] sm:$0xff]  ;;  %v73_v18 = vld [vmem:[%s901_s1 + $0xc8] sm:$0xff] }
   0x7   :  { %137 = vmatprep.subr.mxu0 %v471_v0  ;;  %419 = vmatprep.subr.mxu1 %v471_v0  ;;  %v72_v19 = vld [vmem:[%s901_s1 + $0xc0] sm:$0xff]  ;;  %v71_v20 = vld [vmem:[%s901_s1 + $0xb8] sm:$0xff]  ;;  %v17_v21 = vld [vmem:[%s902_s0 + $0x8] sm:$0xff] }
   0x8   :  { %138 = vmatpush1.msra.mxu0 %v60_v4  ;;  %446 = vmatpush1.msra.mxu1 %v60_v4  ;;  %v70_v22 = vld [vmem:[%s901_s1 + $0xb0] sm:$0xff]  ;;  %v69_v23 = vld [vmem:[%s901_s1 + $0xa8] sm:$0xff]  ;;  %v68_v24 = vld [vmem:[%s901_s1 + $0xa0] sm:$0xff] }
   0x9   :  { %139 = vmatprep.subr.mxu0 %v471_v0  ;;  %420 = vmatprep.subr.mxu1 %v471_v0  ;;  %v67_v25 = vld [vmem:[%s901_s1 + $0x98] sm:$0xff]  ;;  %v66_v26 = vld [vmem:[%s901_s1 + $0x90] sm:$0xff]  ;;  %v65_v27 = vld [vmem:[%s901_s1 + $0x88] sm:$0xff] }
   0xa   :  { %140 = vmatpush1.msra.mxu0 %v59_v5  ;;  %447 = vmatpush1.msra.mxu1 %v59_v5  ;;  %v64_v28 = vld [vmem:[%s901_s1 + $0x80] sm:$0xff]  ;;  %v19_v30 = vld [vmem:[%s902_s0 + $0x18] sm:$0xff]  ;;  %v33_v31 = vld [vmem:[%s902_s0 + $0x88] sm:$0xff] }
   0xb   :  { %141 = vmatprep.subr.mxu0 %v471_v0  ;;  %421 = vmatprep.subr.mxu1 %v471_v0  ;;  %v16_v29 = vld [vmem:[%s902_s0] sm:$0xff]  ;;  %v35_v33 = vld [vmem:[%s902_s0 + $0x98] sm:$0xff]  ;;  %v18_v34 = vld [vmem:[%s902_s0 + $0x10] sm:$0xff] }
   0xc   :  { %142 = vmatpush1.msra.mxu0 %v58_v6  ;;  %448 = vmatpush1.msra.mxu1 %v58_v6  ;;  %v32_v32 = vld [vmem:[%s902_s0 + $0x80] sm:$0xff]  ;;  %v21_v35 = vld [vmem:[%s902_s0 + $0x28] sm:$0xff]  ;;  %v34_v36 = vld [vmem:[%s902_s0 + $0x90] sm:$0xff] }
   0xd   :  { %143 = vmatprep.subr.mxu0 %v471_v0  ;;  %422 = vmatprep.subr.mxu1 %v471_v0  ;;  %v37_v37 = vld [vmem:[%s902_s0 + $0xa8] sm:$0xff]  ;;  %v20_v38 = vld [vmem:[%s902_s0 + $0x20] sm:$0xff]  ;;  %v23_v39 = vld [vmem:[%s902_s0 + $0x38] sm:$0xff] }
   0xe   :  { %144 = vmatpush1.msra.mxu0 %v57_v7  ;;  %449 = vmatpush1.msra.mxu1 %v57_v7  ;;  %v36_v40 = vld [vmem:[%s902_s0 + $0xa0] sm:$0xff]  ;;  %v39_v41 = vld [vmem:[%s902_s0 + $0xb8] sm:$0xff]  ;;  %v22_v42 = vld [vmem:[%s902_s0 + $0x30] sm:$0xff] }
   0xf   :  { %145 = vmatprep.subr.mxu0 %v471_v0  ;;  %423 = vmatprep.subr.mxu1 %v471_v0  ;;  %v25_v43 = vld [vmem:[%s902_s0 + $0x48] sm:$0xff]  ;;  %v38_v44 = vld [vmem:[%s902_s0 + $0xb0] sm:$0xff]  ;;  %v24_v46 = vld [vmem:[%s902_s0 + $0x40] sm:$0xff] }
  0x10   :  { %146 = vmatpush1.msra.mxu0 %v56_v8  ;;  %450 = vmatpush1.msra.mxu1 %v56_v8  ;;  %v41_v45 = vld [vmem:[%s902_s0 + $0xc8] sm:$0xff]  ;;  %v27_v47 = vld [vmem:[%s902_s0 + $0x58] sm:$0xff]  ;;  %v40_v48 = vld [vmem:[%s902_s0 + $0xc0] sm:$0xff] }
  0x11   :  { %147 = vmatprep.subr.mxu0 %v471_v0  ;;  %424 = vmatprep.subr.mxu1 %v471_v0  ;;  %v43_v49 = vld [vmem:[%s902_s0 + $0xd8] sm:$0xff]  ;;  %v26_v50 = vld [vmem:[%s902_s0 + $0x50] sm:$0xff]  ;;  %v29_v51 = vld [vmem:[%s902_s0 + $0x68] sm:$0xff] }
  0x12   :  { %148 = vmatpush1.msra.mxu0 %v55_v9  ;;  %451 = vmatpush1.msra.mxu1 %v55_v9  ;;  %v42_v52 = vld [vmem:[%s902_s0 + $0xd0] sm:$0xff]  ;;  %v45_v53 = vld [vmem:[%s902_s0 + $0xe8] sm:$0xff]  ;;  %v28_v54 = vld [vmem:[%s902_s0 + $0x60] sm:$0xff] }
  0x13   :  { %149 = vmatprep.subr.mxu0 %v471_v0  ;;  %425 = vmatprep.subr.mxu1 %v471_v0  ;;  %v31_v55 = vld [vmem:[%s902_s0 + $0x78] sm:$0xff]  ;;  %v44_v56 = vld [vmem:[%s902_s0 + $0xe0] sm:$0xff]  ;;  %v30_v58 = vld [vmem:[%s902_s0 + $0x70] sm:$0xff] }
  0x14   :  { %150 = vmatpush1.msra.mxu0 %v54_v10  ;;  %452 = vmatpush1.msra.mxu1 %v54_v10  ;;  %v47_v57 = vld [vmem:[%s902_s0 + $0xf8] sm:$0xff]  ;;  %v46_v59 = vld [vmem:[%s902_s0 + $0xf0] sm:$0xff]  ;;  %v747_v60 = vld [vmem:[%s903_s2] ss:$0 sm:$0xff] }
  0x15   :  { %151 = vmatprep.subr.mxu0 %v471_v0  ;;  %426 = vmatprep.subr.mxu1 %v471_v0 }
  0x16   :  { %152 = vmatpush1.msra.mxu0 %v53_v11  ;;  %453 = vmatpush1.msra.mxu1 %v53_v11 }
  0x17   :  { %153 = vmatprep.subr.mxu0 %v471_v0  ;;  %427 = vmatprep.subr.mxu1 %v471_v0 }
  0x18   :  { %154 = vmatpush1.msra.mxu0 %v52_v12  ;;  %454 = vmatpush1.msra.mxu1 %v52_v12 }
  0x19   :  { %155 = vmatprep.subr.mxu0 %v471_v0  ;;  %428 = vmatprep.subr.mxu1 %v471_v0 }
  0x1a   :  { %156 = vmatpush1.msra.mxu0 %v51_v13  ;;  %455 = vmatpush1.msra.mxu1 %v51_v13 }
  0x1b   :  { %157 = vmatprep.subr.mxu0 %v471_v0  ;;  %429 = vmatprep.subr.mxu1 %v471_v0 }
  0x1c   :  { %158 = vmatpush1.msra.mxu0 %v50_v14  ;;  %456 = vmatpush1.msra.mxu1 %v50_v14 }
  0x1d   :  { %159 = vmatprep.subr.mxu0 %v471_v0  ;;  %430 = vmatprep.subr.mxu1 %v471_v0 }
  0x1e   :  { %160 = vmatpush1.msra.mxu0 %v49_v15  ;;  %457 = vmatpush1.msra.mxu1 %v49_v15 }
  0x1f   :  { %161 = vmatprep.subr.mxu0 %v471_v0  ;;  %431 = vmatprep.subr.mxu1 %v471_v0 }
  0x20   :  { %162 = vmatpush1.msra.mxu0 %v48_v16  ;;  %458 = vmatpush1.msra.mxu1 %v48_v16 }
  0x21   :  { %173 = vmatprep.subr.mxu0 %v471_v0  ;;  %432 = vmatprep.subr.mxu1 %v471_v0 }
  0x22   :  { %174 = vmatpush2.msra.mxu0 %v74_v17  ;;  %459 = vmatpush2.msra.mxu1 %v74_v17 }
  0x23   :  { %175 = vmatprep.subr.mxu0 %v471_v0  ;;  %433 = vmatprep.subr.mxu1 %v471_v0 }
  0x24   :  { %176 = vmatpush2.msra.mxu0 %v73_v18  ;;  %460 = vmatpush2.msra.mxu1 %v73_v18 }
  0x25   :  { %177 = vmatprep.subr.mxu0 %v471_v0  ;;  %434 = vmatprep.subr.mxu1 %v471_v0 }
  0x26   :  { %178 = vmatpush2.msra.mxu0 %v72_v19  ;;  %461 = vmatpush2.msra.mxu1 %v72_v19 }
  0x27   :  { %179 = vmatprep.subr.mxu0 %v471_v0  ;;  %435 = vmatprep.subr.mxu1 %v471_v0 }
  0x28   :  { %180 = vmatpush2.msra.mxu0 %v71_v20  ;;  %462 = vmatpush2.msra.mxu1 %v71_v20 }
  0x29   :  { %181 = vmatprep.subr.mxu0 %v471_v0  ;;  %400 = vmatprep.mubr.msk.f32.mxu0 %vm82_vm0, %v17_v21 }
  0x2a   :  { %182 = vmatpush2.msra.mxu0 %v70_v22  ;;  %436 = vmatprep.subr.mxu1 %v471_v0 }
  0x2b   :  { %183 = vmatprep.subr.mxu0 %v471_v0  ;;  %463 = vmatpush2.msra.mxu1 %v70_v22 }
  0x2c   :  { %184 = vmatpush2.msra.mxu0 %v69_v23  ;;  %437 = vmatprep.subr.mxu1 %v471_v0 }
  0x2d   :  { %185 = vmatprep.subr.mxu0 %v471_v0  ;;  %464 = vmatpush2.msra.mxu1 %v69_v23 }
  0x2e   :  { %186 = vmatpush2.msra.mxu0 %v68_v24  ;;  %438 = vmatprep.subr.mxu1 %v471_v0 }
  0x2f   :  { %187 = vmatprep.subr.mxu0 %v471_v0  ;;  %465 = vmatpush2.msra.mxu1 %v68_v24 }
  0x30   :  { %188 = vmatpush2.msra.mxu0 %v67_v25  ;;  %439 = vmatprep.subr.mxu1 %v471_v0 }
  0x31   :  { %189 = vmatprep.subr.mxu0 %v471_v0  ;;  %466 = vmatpush2.msra.mxu1 %v67_v25 }
  0x32   :  { %190 = vmatpush2.msra.mxu0 %v66_v26  ;;  %440 = vmatprep.subr.mxu1 %v471_v0 }
  0x33   :  { %191 = vmatprep.subr.mxu0 %v471_v0  ;;  %467 = vmatpush2.msra.mxu1 %v66_v26 }
  0x34   :  { %192 = vmatpush2.msra.mxu0 %v65_v27  ;;  %441 = vmatprep.subr.mxu1 %v471_v0 }
  0x35   :  { %193 = vmatprep.subr.mxu0 %v471_v0  ;;  %468 = vmatpush2.msra.mxu1 %v65_v27 }
  0x36   :  { %194 = vmatpush2.msra.mxu0 %v64_v28  ;;  %442 = vmatprep.subr.mxu1 %v471_v0 }
  0x37   :  { %196 = vmatmul.mubr.f32.vlgmr.msra.gmra.mxu0 %v16_v29  ;;  %469 = vmatpush2.msra.mxu1 %v64_v28 }
  0x38   :  { %401 = vmatprep.mubr.msk.f32.mxu0 %vm82_vm0, %v19_v30  ;;  %408 = vmatprep.mubr.msk.f32.mxu1 %vm82_vm0, %v33_v31 }
  0x39   :  { %236 = vmatmul.mubr.f32.vlgmr.msra.gmra.mxu1 %v32_v32 }
  0x3a   :  { %409 = vmatprep.mubr.msk.f32.mxu1 %vm82_vm0, %v35_v33 }
  0x3b   :  { %201 = vmatmul.mubr.f32.gmra.mxu0 %v18_v34 }
  0x3c   :  { %402 = vmatprep.mubr.msk.f32.mxu0 %vm82_vm0, %v21_v35 }
  0x3d   :  { %241 = vmatmul.mubr.f32.gmra.mxu1 %v34_v36 }
  0x3e   :  { %410 = vmatprep.mubr.msk.f32.mxu1 %vm82_vm0, %v37_v37 }
  0x3f   :  { %206 = vmatmul.mubr.f32.gmra.mxu0 %v20_v38 }
  0x40   :  { %403 = vmatprep.mubr.msk.f32.mxu0 %vm82_vm0, %v23_v39 }
  0x41   :  { %246 = vmatmul.mubr.f32.gmra.mxu1 %v36_v40 }
  0x42   :  { %411 = vmatprep.mubr.msk.f32.mxu1 %vm82_vm0, %v39_v41 }
  0x43   :  { %211 = vmatmul.mubr.f32.gmra.mxu0 %v22_v42 }
  0x44   :  { %404 = vmatprep.mubr.msk.f32.mxu0 %vm82_vm0, %v25_v43 }
  0x45   :  { %251 = vmatmul.mubr.f32.gmra.mxu1 %v38_v44 }
  0x46   :  { %412 = vmatprep.mubr.msk.f32.mxu1 %vm82_vm0, %v41_v45 }
  0x47   :  { %216 = vmatmul.mubr.f32.gmra.mxu0 %v24_v46 }
  0x48   :  { %405 = vmatprep.mubr.msk.f32.mxu0 %vm82_vm0, %v27_v47 }
  0x49   :  { %256 = vmatmul.mubr.f32.gmra.mxu1 %v40_v48 }
  0x4a   :  { %413 = vmatprep.mubr.msk.f32.mxu1 %vm82_vm0, %v43_v49 }
  0x4b   :  { %221 = vmatmul.mubr.f32.gmra.mxu0 %v26_v50 }
  0x4c   :  { %406 = vmatprep.mubr.msk.f32.mxu0 %vm82_vm0, %v29_v51 }
  0x4d   :  { %261 = vmatmul.mubr.f32.gmra.mxu1 %v42_v52 }
  0x4e   :  { %414 = vmatprep.mubr.msk.f32.mxu1 %vm82_vm0, %v45_v53 }
  0x4f   :  { %226 = vmatmul.mubr.f32.gmra.mxu0 %v28_v54 }
  0x50   :  { %407 = vmatprep.mubr.msk.f32.mxu0 %vm82_vm0, %v31_v55 }
  0x51   :  { %266 = vmatmul.mubr.f32.gmra.mxu1 %v44_v56 }
  0x52   :  { %415 = vmatprep.mubr.msk.f32.mxu1 %vm82_vm0, %v47_v57 }
  0x53   :  { %231 = vmatmul.mubr.f32.gmra.mxu0 %v30_v58 }
  0x55   :  { %271 = vmatmul.mubr.f32.gmra.mxu1 %v46_v59 }
  0xf7   :  { %v197_v61 = vpop.f32.mrf.mxu0 }
  0xf8   :  { %v198_v62 = vadd.f32 %v747_v60, %v197_v61 }
  0xf9   :  { %v199_v63 = vpop.f32.mrf.mxu0  ;;  %v237_v0 = vpop.f32.mrf.mxu1 }
  0xfa   :  { %277 = vst.msk [vmem:[%s904_s3] sm:$0xff] %vm276_vm1, %v198_v62  ;;  %v755_v1 = vadd.f32 %v747_v60, %v237_v0  ;;  %v330_v21 = vmul.f32 %v198_v62, %v198_v62  ;;  %v293_v27 = vsel %vm276_vm1, %v198_v62, 0.0 }
  0xfb   :  { %v202_v2 = vpop.f32.mrf.mxu0  ;;  %v239_v3 = vpop.f32.mrf.mxu1 }
  0xfc   :  { %v203_v4 = vadd.f32 %v747_v60, %v202_v2  ;;  %285 = vst.msk [vmem:[%s904_s3 + $0x40] sm:$0xff] %vm276_vm1, %v755_v1  ;;  %v346_v34 = vsel %vm276_vm1, %v330_v21, 0.0 }
  0xfd   :  { %v204_v5 = vpop.f32.mrf.mxu0  ;;  %v242_v6 = vpop.f32.mrf.mxu1 }
  0xfe   :  { %278 = vst.msk [vmem:[%s904_s3 + $0x8] sm:$0xff] %vm276_vm1, %v203_v4  ;;  %v768_v7 = vadd.f32 %v747_v60, %v242_v6  ;;  %v331_v19 = vmul.f32 %v203_v4, %v203_v4  ;;  %v294_v24 = vsel %vm276_vm1, %v203_v4, 0.0 }
  0xff   :  { %v207_v8 = vpop.f32.mrf.mxu0  ;;  %v244_v9 = vpop.f32.mrf.mxu1  ;;  %v295_v35 = vadd.f32 %v294_v24, %v293_v27 }
 0x100   :  { %v208_v10 = vadd.f32 %v747_v60, %v207_v8  ;;  %286 = vst.msk [vmem:[%s904_s3 + $0x48] sm:$0xff] %vm276_vm1, %v768_v7  ;;  %v347_v30 = vsel %vm276_vm1, %v331_v19, 0.0  ;;  %v339_v24 = vmul.f32 %v768_v7, %v768_v7 }
 0x101   :  { %v209_v11 = vpop.f32.mrf.mxu0  ;;  %v247_v12 = vpop.f32.mrf.mxu1  ;;  %v348_v42 = vadd.f32 %v347_v30, %v346_v34 }
 0x102   :  { %279 = vst.msk [vmem:[%s904_s3 + $0x10] sm:$0xff] %vm276_vm1, %v208_v10  ;;  %v781_v13 = vadd.f32 %v747_v60, %v247_v12  ;;  %v332_v25 = vmul.f32 %v208_v10, %v208_v10  ;;  %v296_v31 = vsel %vm276_vm1, %v208_v10, 0.0 }
 0x103   :  { %v212_v14 = vpop.f32.mrf.mxu0  ;;  %v249_v15 = vpop.f32.mrf.mxu1  ;;  %v297_v43 = vadd.f32 %v296_v31, %v295_v35  ;;  %v363_v31 = vsel %vm276_vm1, %v339_v24, 0.0 }
 0x104   :  { %v213_v16 = vadd.f32 %v747_v60, %v212_v14  ;;  %287 = vst.msk [vmem:[%s904_s3 + $0x50] sm:$0xff] %vm276_vm1, %v781_v13  ;;  %v349_v38 = vsel %vm276_vm1, %v332_v25, 0.0  ;;  %v338_v15 = vmul.f32 %v755_v1, %v755_v1 }
 0x105   :  { %v214_v17 = vpop.f32.mrf.mxu0  ;;  %v252_v18 = vpop.f32.mrf.mxu1  ;;  %v350_v50 = vadd.f32 %v349_v38, %v348_v42 }
 0x106   :  { %280 = vst.msk [vmem:[%s904_s3 + $0x18] sm:$0xff] %vm276_vm1, %v213_v16  ;;  %v794_v20 = vadd.f32 %v747_v60, %v252_v18  ;;  %v333_v32 = vmul.f32 %v213_v16, %v213_v16  ;;  %v298_v39 = vsel %vm276_vm1, %v213_v16, 0.0 }
 0x107   :  { %v217_v22 = vpop.f32.mrf.mxu0  ;;  %v254_v23 = vpop.f32.mrf.mxu1  ;;  %v299_v51 = vadd.f32 %v298_v39, %v297_v43 }
 0x108   :  { %v218_v26 = vadd.f32 %v747_v60, %v217_v22  ;;  %288 = vst.msk [vmem:[%s904_s3 + $0x58] sm:$0xff] %vm276_vm1, %v794_v20  ;;  %v351_v46 = vsel %vm276_vm1, %v333_v32, 0.0  ;;  %v308_v23 = vsel %vm276_vm1, %v755_v1, 0.0  ;;  %v340_v1 = vmul.f32 %v781_v13, %v781_v13 }
 0x109   :  { %v219_v28 = vpop.f32.mrf.mxu0  ;;  %v257_v29 = vpop.f32.mrf.mxu1  ;;  %v352_v57 = vadd.f32 %v351_v46, %v350_v50  ;;  %v312_v32 = vsel %vm276_vm1, %v781_v13, 0.0  ;;  %v341_v34 = vmul.f32 %v794_v20, %v794_v20 }
 0x10a   :  { %281 = vst.msk [vmem:[%s904_s3 + $0x20] sm:$0xff] %vm276_vm1, %v218_v26  ;;  %v811_v33 = vadd.f32 %v747_v60, %v257_v29  ;;  %v334_v40 = vmul.f32 %v218_v26, %v218_v26  ;;  %v300_v47 = vsel %vm276_vm1, %v218_v26, 0.0  ;;  %v310_v28 = vsel %vm276_vm1, %v768_v7, 0.0 }
 0x10b   :  { %v222_v36 = vpop.f32.mrf.mxu0  ;;  %v259_v37 = vpop.f32.mrf.mxu1  ;;  %v301_v58 = vadd.f32 %v300_v47, %v299_v51  ;;  %v314_v7 = vsel %vm276_vm1, %v794_v20, 0.0 }
 0x10c   :  { %v223_v41 = vadd.f32 %v747_v60, %v222_v36  ;;  %289 = vst.msk [vmem:[%s904_s3 + $0x60] sm:$0xff] %vm276_vm1, %v811_v33  ;;  %v353_v54 = vsel %vm276_vm1, %v334_v40, 0.0  ;;  %v365_v37 = vsel %vm276_vm1, %v340_v1, 0.0  ;;  %v342_v38 = vmul.f32 %v811_v33, %v811_v33 }
 0x10d   :  { %v224_v44 = vpop.f32.mrf.mxu0  ;;  %v262_v45 = vpop.f32.mrf.mxu1  ;;  %v354_v3 = vadd.f32 %v353_v54, %v352_v57  ;;  %v316_v13 = vsel %vm276_vm1, %v811_v33, 0.0 }
 0x10e   :  { %282 = vst.msk [vmem:[%s904_s3 + $0x28] sm:$0xff] %vm276_vm1, %v223_v41  ;;  %v335_v48 = vmul.f32 %v223_v41, %v223_v41  ;;  %v829_v49 = vadd.f32 %v747_v60, %v262_v45  ;;  %v302_v55 = vsel %vm276_vm1, %v223_v41, 0.0  ;;  %v367_v41 = vsel %vm276_vm1, %v341_v34, 0.0 }
 0x10f   :  { %v227_v52 = vpop.f32.mrf.mxu0  ;;  %v264_v53 = vpop.f32.mrf.mxu1  ;;  %v303_v4 = vadd.f32 %v302_v55, %v301_v58  ;;  %v369_v45 = vsel %vm276_vm1, %v342_v38, 0.0 }
 0x110   :  { %v228_v56 = vadd.f32 %v747_v60, %v227_v52  ;;  %290 = vst.msk [vmem:[%s904_s3 + $0x68] sm:$0xff] %vm276_vm1, %v829_v49  ;;  %v355_v62 = vsel %vm276_vm1, %v335_v48, 0.0  ;;  %v343_v42 = vmul.f32 %v829_v49, %v829_v49  ;;  %v318_v20 = vsel %vm276_vm1, %v829_v49, 0.0 }
 0x111   :  { %v229_v59 = vpop.f32.mrf.mxu0  ;;  %v267_v61 = vpop.f32.mrf.mxu1  ;;  %v356_v10 = vadd.f32 %v355_v62, %v354_v3 }
 0x112   :  { %283 = vst.msk [vmem:[%s904_s3 + $0x30] sm:$0xff] %vm276_vm1, %v228_v56  ;;  %v304_v63 = vsel %vm276_vm1, %v228_v56, 0.0  ;;  %v336_v0 = vmul.f32 %v228_v56, %v228_v56  ;;  %v268_v2 = vadd.f32 %v747_v60, %v267_v61  ;;  %v371_v51 = vsel %vm276_vm1, %v343_v42, 0.0 }
 0x113   :  { %v232_v5 = vpop.f32.mrf.mxu0  ;;  %v269_v6 = vpop.f32.mrf.mxu1  ;;  %v305_v11 = vadd.f32 %v304_v63, %v303_v4  ;;  %v383_v63 = vlaneseq }
 0x114   :  { %v357_v8 = vsel %vm276_vm1, %v336_v0, 0.0  ;;  %v233_v9 = vadd.f32 %v747_v60, %v232_v5  ;;  %291 = vst.msk [vmem:[%s904_s3 + $0x70] sm:$0xff] %vm276_vm1, %v268_v2  ;;  %v344_v46 = vmul.f32 %v268_v2, %v268_v2  ;;  %v320_v52 = vsel %vm276_vm1, %v268_v2, 0.0 }
 0x115   :  { %v234_v12 = vpop.f32.mrf.mxu0  ;;  %v272_v14 = vpop.f32.mrf.mxu1  ;;  %v358_v19 = vadd.f32 %v357_v8, %v356_v10  ;;  %v384_v2 = vshrl.u32 %v383_v63, 7 }
 0x116   :  { %284 = vst.msk [vmem:[%s904_s3 + $0x38] sm:$0xff] %vm276_vm1, %v233_v9  ;;  %v306_v16 = vsel %vm276_vm1, %v233_v9, 0.0  ;;  %v337_v17 = vmul.f32 %v233_v9, %v233_v9  ;;  %v273_v18 = vadd.f32 %v747_v60, %v272_v14  ;;  %v361_v60 = vsel %vm276_vm1, %v338_v15, 0.0 }
 0x117   :  { %v307_v21 = vadd.f32 %v306_v16, %v305_v11  ;;  %v274_v22 = vpop.f32.mrf.mxu1  ;;  %v373_v55 = vsel %vm276_vm1, %v344_v46, 0.0  ;;  %vm385_vm2 = vcmp.eq.s32.totalorder %v384_v2, 0  ;;  %vm387_vm3 = vcmp.eq.s32.totalorder %v384_v2, 1 }
 0x118   :  { %v359_v25 = vsel %vm276_vm1, %v337_v17, 0.0  ;;  %292 = vst.msk [vmem:[%s904_s3 + $0x78] sm:$0xff] %vm276_vm1, %v273_v18  ;;  %v345_v47 = vmul.f32 %v273_v18, %v273_v18  ;;  %v322_v33 = vsel %vm276_vm1, %v273_v18, 0.0 }
 0x119   :  { %v309_v26 = vadd.f32 %v308_v23, %v307_v21  ;;  %v360_v27 = vadd.f32 %v359_v25, %v358_v19 }
 0x11a   :  { %v375_v56 = vsel %vm276_vm1, %v345_v47, 0.0 }
 0x11b   :  { %v311_v29 = vadd.f32 %v310_v28, %v309_v26  ;;  %v362_v30 = vadd.f32 %v361_v60, %v360_v27 }
 0x11d   :  { %v364_v35 = vadd.f32 %v363_v31, %v362_v30  ;;  %v313_v36 = vadd.f32 %v312_v32, %v311_v29 }
 0x11f   :  { %v315_v39 = vadd.f32 %v314_v7, %v313_v36  ;;  %v366_v40 = vadd.f32 %v365_v37, %v364_v35 }
 0x121   :  { %v317_v43 = vadd.f32 %v316_v13, %v315_v39  ;;  %v368_v44 = vadd.f32 %v367_v41, %v366_v40 }
 0x123   :  { %v370_v48 = vadd.f32 %v369_v45, %v368_v44  ;;  %v319_v50 = vadd.f32 %v318_v20, %v317_v43 }
 0x125   :  { %v372_v53 = vadd.f32 %v371_v51, %v370_v48  ;;  %v321_v54 = vadd.f32 %v320_v52, %v319_v50 }
 0x127   :  { %v374_v57 = vadd.f32 %v373_v55, %v372_v53  ;;  %v323_v58 = vadd.f32 %v322_v33, %v321_v54 }
 0x129   :  { %v324_v59 = vrot.slane %v323_v58, 4  ;;  %v376_v49 = vadd.f32 %v375_v56, %v374_v57 }
 0x12b   :  { %v325_v61 = vadd.f32 %v324_v59, %v323_v58  ;;  %v377_v62 = vrot.slane %v376_v49, 4 }
 0x12d   :  { %v326_v0 = vrot.slane %v325_v61, 2  ;;  %v378_v3 = vadd.f32 %v377_v62, %v376_v49 }
 0x12f   :  { %v327_v4 = vadd.f32 %v326_v0, %v325_v61  ;;  %v379_v5 = vrot.slane %v378_v3, 2 }
 0x131   :  { %v328_v6 = vrot.slane %v327_v4, 1  ;;  %v380_v8 = vadd.f32 %v379_v5, %v378_v3 }
 0x133   :  { %v329_v9 = vadd.f32 %v328_v6, %v327_v4  ;;  %v381_v10 = vrot.slane %v380_v8, 1 }
 0x135   :  { %v382_v11 = vadd.f32 %v381_v10, %v380_v8  ;;  %v386_v12 = vsel %vm385_vm2, %v329_v9, 0.0 }
 0x137   :  { %v388_v14 = vsel %vm387_vm3, %v382_v11, 0.0 }
 0x138   :  { %v389_v15 = vadd.f32 %v388_v14, %v386_v12 }
 0x13a   :  { %390 = vst.msk [vmem:[%s905_s4] sm:$0xff] %vm276_vm1, %v389_v15 }

// kernel: downsampleblock_forward.7
= control target key start
LH: loop header
LB: loop body
LE: loop exit
PB: predicated region body
PF: predicated region fallthrough
CT: control target
= control target key end

     0   :  { %s70_s0 = inlined_call_operand.vmem [shape: f32[8,128], index: 0, kind: input, shape index: {}]   ;;  %s71_s1 = inlined_call_operand.vmem [shape: f32[1,128], index: 1, kind: input, shape index: {}]   ;;  %s72_s2 = inlined_call_operand.vmem [shape: f32[1,128], index: 2, kind: input, shape index: {}]   ;;  %s73_s3 = inlined_call_operand.vmem [shape: f32[8,128], index: 3, kind: output, shape index: {}]  }
   0x1   :  { %v14_v0 = vld [vmem:[%s70_s0] sm:$0xff] }
   0x2   :  { %v36_v1 = vld [vmem:[%s71_s1] ss:$0 sm:$0xff] }
   0x3   :  { %v37_v2 = vld [vmem:[%s72_s2] ss:$0 sm:$0xff]  ;;  %v22_v3 = vmul.f32 %v36_v1, %v14_v0 }
   0x5   :  { %v30_v4 = vadd.f32 %v37_v2, %v22_v3 }
   0x7   :  { %31 = vst [vmem:[%s73_s3] sm:$0xff] %v30_v4 }

</bundles_post_ra>
